<compile_context>
chip_gen: v7x
topology: tpu7x:2x2x1
jax: 0.10.0
libtpu: 0.0.40
codegen_flags: <defaults>
</compile_context>

<pallas_src>
import functools

import jax
import jax.numpy as jnp
from jax.experimental import pallas as pl
from jax.experimental.pallas import tpu as pltpu

# ---- small synthetic BERT config ----
VOCAB = 128
HIDDEN = 32
N_LAYERS = 2
N_HEADS = 2
HEAD_DIM = HIDDEN // N_HEADS
INTERMEDIATE = 64
MAX_POS = 16
TYPE_VOCAB = 2
N_MODELS = 2
LN_EPS = 1e-12


# ---------------- fused per-model BERT forward kernel ----------------

def _bert_fused_kernel(
    emb_ref, mask_ref,
    emb_ln_g_ref, emb_ln_b_ref,
    qkv_w_ref, qkv_b_ref,
    o_w_ref, o_b_ref,
    attn_ln_g_ref, attn_ln_b_ref,
    i_w_ref, i_b_ref,
    f_w_ref, f_b_ref,
    ffn_ln_g_ref, ffn_ln_b_ref,
    mlm_w_ref, mlm_b_ref, mlm_ln_g_ref, mlm_ln_b_ref,
    dec_w_ref, dec_b_ref,
    probs_ref,
):
    def ln(x, g, b):
        mu = jnp.mean(x, axis=-1, keepdims=True)
        var = jnp.mean((x - mu) ** 2, axis=-1, keepdims=True)
        return (x - mu) * jax.lax.rsqrt(var + LN_EPS) * g + b

    def gelu(y):
        # TODO(synk): HF BERT uses erf-GELU; tanh approximation used here for
        # Mosaic-safe lowering (small numerical difference vs reference).
        return 0.5 * y * (1.0 + jnp.tanh(0.7978845608028654 *
                                         (y + 0.044715 * y * y * y)))

    x = emb_ref[0]                       # (T, H), already word+pos+type summed
    mask = mask_ref[...]                 # (T, T) additive mask (pad + batch-block)
    x = ln(x, emb_ln_g_ref[0], emb_ln_b_ref[0])

    scale = 1.0 / (HEAD_DIM ** 0.5)
    for l in range(N_LAYERS):
        # ---- self-attention (fused QKV matmul) ----
        qkv = jnp.dot(x, qkv_w_ref[0, l],
                      preferred_element_type=jnp.float32) + qkv_b_ref[0, l]  # (T, 3H)
        ow = o_w_ref[0, l]                                                   # (H, H)
        attn_out = o_b_ref[0, l]                                             # (1, H)
        for h in range(N_HEADS):
            q = qkv[:, h * HEAD_DIM:(h + 1) * HEAD_DIM]
            k = qkv[:, HIDDEN + h * HEAD_DIM:HIDDEN + (h + 1) * HEAD_DIM]
            v = qkv[:, 2 * HIDDEN + h * HEAD_DIM:2 * HIDDEN + (h + 1) * HEAD_DIM]
            s = jax.lax.dot_general(
                q, k, (((1,), (1,)), ((), ())),
                preferred_element_type=jnp.float32) * scale + mask           # (T, T)
            s = s - jnp.max(s, axis=-1, keepdims=True)
            p = jnp.exp(s)
            p = p * pl.reciprocal(jnp.sum(p, axis=-1, keepdims=True), approx=True)
            ctx_h = jnp.dot(p, v, preferred_element_type=jnp.float32)        # (T, Dh)
            # ctx @ o_w == sum_h ctx_h @ o_w[h*Dh:(h+1)*Dh, :]  (avoids concat)
            attn_out = attn_out + jnp.dot(
                ctx_h, ow[h * HEAD_DIM:(h + 1) * HEAD_DIM, :],
                preferred_element_type=jnp.float32)
        x = ln(x + attn_out, attn_ln_g_ref[0, l], attn_ln_b_ref[0, l])

        # ---- feed-forward ----
        inter = gelu(jnp.dot(x, i_w_ref[0, l],
                             preferred_element_type=jnp.float32) + i_b_ref[0, l])
        ffn_out = jnp.dot(inter, f_w_ref[0, l],
                          preferred_element_type=jnp.float32) + f_b_ref[0, l]
        x = ln(x + ffn_out, ffn_ln_g_ref[0, l], ffn_ln_b_ref[0, l])

    # ---- MLM head ----
    h_ = gelu(jnp.dot(x, mlm_w_ref[0],
                      preferred_element_type=jnp.float32) + mlm_b_ref[0])
    h_ = ln(h_, mlm_ln_g_ref[0], mlm_ln_b_ref[0])
    logits = jnp.dot(h_, dec_w_ref[0],
                     preferred_element_type=jnp.float32) + dec_b_ref[0]      # (T, V)

    # ---- per-model softmax over vocab (exact normalization) ----
    logits = logits - jnp.max(logits, axis=-1, keepdims=True)
    e = jnp.exp(logits)
    probs_ref[0] = e / jnp.sum(e, axis=-1, keepdims=True)


def _ensemble_mean_kernel(p_ref, o_ref):
    acc = p_ref[0]
    for m in range(1, N_MODELS):
        acc = acc + p_ref[m]
    o_ref[...] = acc * (1.0 / N_MODELS)


# ---------------- wrappers ----------------

def fused_ensemble_probs(params, emb, mask, T):
    """Run all N_MODELS backbones; grid over the model axis (parallel on v7x)."""
    L, H, I, V = N_LAYERS, HIDDEN, INTERMEDIATE, VOCAB
    in_specs = [
        pl.BlockSpec((1, T, H), lambda m: (m, 0, 0)),              # emb
        pl.BlockSpec((T, T), lambda m: (0, 0)),                    # mask (shared)
        pl.BlockSpec((1, 1, H), lambda m: (m, 0, 0)),              # emb_ln_g
        pl.BlockSpec((1, 1, H), lambda m: (m, 0, 0)),              # emb_ln_b
        pl.BlockSpec((1, L, H, 3 * H), lambda m: (m, 0, 0, 0)),    # qkv_w
        pl.BlockSpec((1, L, 1, 3 * H), lambda m: (m, 0, 0, 0)),    # qkv_b
        pl.BlockSpec((1, L, H, H), lambda m: (m, 0, 0, 0)),        # o_w
        pl.BlockSpec((1, L, 1, H), lambda m: (m, 0, 0, 0)),        # o_b
        pl.BlockSpec((1, L, 1, H), lambda m: (m, 0, 0, 0)),        # attn_ln_g
        pl.BlockSpec((1, L, 1, H), lambda m: (m, 0, 0, 0)),        # attn_ln_b
        pl.BlockSpec((1, L, H, I), lambda m: (m, 0, 0, 0)),        # i_w
        pl.BlockSpec((1, L, 1, I), lambda m: (m, 0, 0, 0)),        # i_b
        pl.BlockSpec((1, L, I, H), lambda m: (m, 0, 0, 0)),        # f_w
        pl.BlockSpec((1, L, 1, H), lambda m: (m, 0, 0, 0)),        # f_b
        pl.BlockSpec((1, L, 1, H), lambda m: (m, 0, 0, 0)),        # ffn_ln_g
        pl.BlockSpec((1, L, 1, H), lambda m: (m, 0, 0, 0)),        # ffn_ln_b
        pl.BlockSpec((1, H, H), lambda m: (m, 0, 0)),              # mlm_dense_w
        pl.BlockSpec((1, 1, H), lambda m: (m, 0, 0)),              # mlm_dense_b
        pl.BlockSpec((1, 1, H), lambda m: (m, 0, 0)),              # mlm_ln_g
        pl.BlockSpec((1, 1, H), lambda m: (m, 0, 0)),              # mlm_ln_b
        pl.BlockSpec((1, H, V), lambda m: (m, 0, 0)),              # decoder_w
        pl.BlockSpec((1, 1, V), lambda m: (m, 0, 0)),              # decoder_b
    ]
    return pl.pallas_call(
        _bert_fused_kernel,
        out_shape=jax.ShapeDtypeStruct((N_MODELS, T, V), jnp.float32),
        grid=(N_MODELS,),
        in_specs=in_specs,
        out_specs=pl.BlockSpec((1, T, V), lambda m: (m, 0, 0)),
        compiler_params=pltpu.CompilerParams(
            dimension_semantics=("parallel",)),   # 2 TCs on v7x; no-op elsewhere
    )(
        emb, mask,
        params["emb_ln_g"], params["emb_ln_b"],
        params["qkv_w"], params["qkv_b"],
        params["o_w"], params["o_b"],
        params["attn_ln_g"], params["attn_ln_b"],
        params["i_w"], params["i_b"],
        params["f_w"], params["f_b"],
        params["ffn_ln_g"], params["ffn_ln_b"],
        params["mlm_dense_w"], params["mlm_dense_b"],
        params["mlm_ln_g"], params["mlm_ln_b"],
        params["decoder_w"], params["decoder_b"],
    )


def ensemble_mean(probs_nm):
    N, T, V = probs_nm.shape
    return pl.pallas_call(
        _ensemble_mean_kernel,
        out_shape=jax.ShapeDtypeStruct((T, V), jnp.float32),
        in_specs=[pl.BlockSpec(memory_space=pltpu.MemorySpace.VMEM)],
        out_specs=pl.BlockSpec(memory_space=pltpu.MemorySpace.VMEM),
    )(probs_nm)


def ensemble_forward(params, input_ids, attention_mask, token_type_ids):
    B, S = input_ids.shape
    T = B * S

    # ---- embedding gathers (plain-JAX glue), done for all models at once ----
    word = params["word_emb"][:, input_ids]                       # (N, B, S, H)
    pos = params["pos_emb"][:, :S][:, None, :, :]                 # (N, 1, S, H)
    typ = params["type_emb"][:, token_type_ids]                   # (N, B, S, H)
    emb = (word + pos + typ).reshape(N_MODELS, T, HIDDEN).astype(jnp.float32)

    # ---- additive attention mask, block-diagonal over batches + HF padding ----
    batch_idx = jnp.arange(T) // S
    same_batch = batch_idx[:, None] == batch_idx[None, :]
    key_valid = attention_mask.reshape(T).astype(jnp.float32)
    pad_add = (1.0 - key_valid)[None, :] * -10000.0               # HF convention
    mask = jnp.where(same_batch, pad_add, -1e9).astype(jnp.float32)   # (T, T)

    probs_nm = fused_ensemble_probs(params, emb, mask, T)         # (N, T, V)
    probs = ensemble_mean(probs_nm)                               # (T, V)
    return probs.reshape(B, S, VOCAB)


# ---------------- synthetic parameter init ----------------
# TODO(synk): real EnsembleModel loads pretrained HF weights and ties the MLM
# decoder to the word embeddings; here weights are random and untied.

def init_ensemble_params(key):
    keys = iter(jax.random.split(key, 32))

    def w(shape):
        return jax.random.normal(next(keys), shape, jnp.float32) * 0.02

    def zeros(shape):
        return jnp.zeros(shape, jnp.float32)

    def ones(shape):
        return jnp.ones(shape, jnp.float32)

    N, L, H, I, V = N_MODELS, N_LAYERS, HIDDEN, INTERMEDIATE, VOCAB
    return {
        "word_emb": w((N, V, H)),
        "pos_emb": w((N, MAX_POS, H)),
        "type_emb": w((N, TYPE_VOCAB, H)),
        "emb_ln_g": ones((N, 1, H)), "emb_ln_b": zeros((N, 1, H)),
        "qkv_w": w((N, L, H, 3 * H)), "qkv_b": zeros((N, L, 1, 3 * H)),
        "o_w": w((N, L, H, H)), "o_b": zeros((N, L, 1, H)),
        "attn_ln_g": ones((N, L, 1, H)), "attn_ln_b": zeros((N, L, 1, H)),
        "i_w": w((N, L, H, I)), "i_b": zeros((N, L, 1, I)),
        "f_w": w((N, L, I, H)), "f_b": zeros((N, L, 1, H)),
        "ffn_ln_g": ones((N, L, 1, H)), "ffn_ln_b": zeros((N, L, 1, H)),
        "mlm_dense_w": w((N, H, H)), "mlm_dense_b": zeros((N, 1, H)),
        "mlm_ln_g": ones((N, 1, H)), "mlm_ln_b": zeros((N, 1, H)),
        "decoder_w": w((N, H, V)), "decoder_b": zeros((N, 1, V)),
    }


if __name__ == "__main__":
    key = jax.random.PRNGKey(0)
    k_data, k_params = jax.random.split(key)

    B, S = 2, 8
    input_ids = jax.random.randint(k_data, (B, S), 0, VOCAB, dtype=jnp.int32)
    attention_mask = jnp.ones((B, S), jnp.int32).at[:, -2:].set(0)  # pad last 2 tokens
    token_type_ids = jnp.zeros((B, S), jnp.int32)

    params = init_ensemble_params(k_params)

    probs = jax.jit(ensemble_forward)(params, input_ids, attention_mask,
                                      token_type_ids)
    probs = jax.block_until_ready(probs)

    assert probs.shape == (B, S, VOCAB)
    # rows of the averaged softmax must sum to ~1
    assert jnp.allclose(jnp.sum(probs, axis=-1), 1.0, atol=1e-4)
    print("KERNEL_OK")
</pallas_src>

<mosaic_0001>
module attributes {stable_mosaic.version = 11 : i64} {
  func.func @_ensemble_mean_kernel(%arg0: memref<2x16x128xf32, #tpu.memory_space<vmem>>, %arg1: memref<16x128xf32, #tpu.memory_space<vmem>>) attributes {dimension_semantics = [], scalar_prefetch = 0 : i64, scratch_operands = 0 : i64, tpu.core_type = #tpu.core_type<tc>} {
    %c0 = arith.constant 0 : index
    %c0_0 = arith.constant 0 : index
    %c0_1 = arith.constant 0 : index
    %0 = vector.load %arg0[%c0, %c0_0, %c0_1] : memref<2x16x128xf32, #tpu.memory_space<vmem>>, vector<1x16x128xf32>
    %1 = vector.shape_cast %0 : vector<1x16x128xf32> to vector<16x128xf32>
    %c1 = arith.constant 1 : index
    %c0_2 = arith.constant 0 : index
    %c0_3 = arith.constant 0 : index
    %2 = vector.load %arg0[%c1, %c0_2, %c0_3] : memref<2x16x128xf32, #tpu.memory_space<vmem>>, vector<1x16x128xf32>
    %3 = vector.shape_cast %2 : vector<1x16x128xf32> to vector<16x128xf32>
    %4 = arith.addf %1, %3 : vector<16x128xf32>
    %cst = arith.constant 5.000000e-01 : f32
    %5 = vector.broadcast %cst : f32 to vector<16x128xf32>
    %6 = arith.mulf %4, %5 : vector<16x128xf32>
    %c0_4 = arith.constant 0 : index
    %c0_5 = arith.constant 0 : index
    %7 = vector.load %arg1[%c0_4, %c0_5] : memref<16x128xf32, #tpu.memory_space<vmem>>, vector<16x128xf32>
    tpu.vector_store %arg1[%c0_4, %c0_5], %6 {strides = array<i32>} : memref<16x128xf32, #tpu.memory_space<vmem>>, vector<16x128xf32>,
    return
  }
}

module attributes {stable_mosaic.version = 11 : i64} {
  func.func @_bert_fused_kernel(%arg0: i32, %arg1: memref<1x16x32xf32, #tpu.memory_space<vmem>>, %arg2: memref<16x16xf32, #tpu.memory_space<vmem>>, %arg3: memref<1x1x32xf32, #tpu.memory_space<vmem>>, %arg4: memref<1x1x32xf32, #tpu.memory_space<vmem>>, %arg5: memref<1x2x32x96xf32, #tpu.memory_space<vmem>>, %arg6: memref<1x2x1x96xf32, #tpu.memory_space<vmem>>, %arg7: memref<1x2x32x32xf32, #tpu.memory_space<vmem>>, %arg8: memref<1x2x1x32xf32, #tpu.memory_space<vmem>>, %arg9: memref<1x2x1x32xf32, #tpu.memory_space<vmem>>, %arg10: memref<1x2x1x32xf32, #tpu.memory_space<vmem>>, %arg11: memref<1x2x32x64xf32, #tpu.memory_space<vmem>>, %arg12: memref<1x2x1x64xf32, #tpu.memory_space<vmem>>, %arg13: memref<1x2x64x32xf32, #tpu.memory_space<vmem>>, %arg14: memref<1x2x1x32xf32, #tpu.memory_space<vmem>>, %arg15: memref<1x2x1x32xf32, #tpu.memory_space<vmem>>, %arg16: memref<1x2x1x32xf32, #tpu.memory_space<vmem>>, %arg17: memref<1x32x32xf32, #tpu.memory_space<vmem>>, %arg18: memref<1x1x32xf32, #tpu.memory_space<vmem>>, %arg19: memref<1x1x32xf32, #tpu.memory_space<vmem>>, %arg20: memref<1x1x32xf32, #tpu.memory_space<vmem>>, %arg21: memref<1x32x128xf32, #tpu.memory_space<vmem>>, %arg22: memref<1x1x128xf32, #tpu.memory_space<vmem>>, %arg23: memref<1x16x128xf32, #tpu.memory_space<vmem>>) attributes {dimension_semantics = [#tpu.dimension_semantics<parallel>], iteration_bounds = array<i64: 2>, scalar_prefetch = 0 : i64, scratch_operands = 0 : i64, tpu.core_type = #tpu.core_type<tc>, window_params = [{transform_indices = @transform_0, window_bounds = array<i64: 1, 16, 32>}, {pipeline_mode = #tpu.pipeline_mode<synchronous>, transform_indices = @transform_1, window_bounds = array<i64: 16, 16>}, {transform_indices = @transform_2, window_bounds = array<i64: 1, 1, 32>}, {transform_indices = @transform_3, window_bounds = array<i64: 1, 1, 32>}, {transform_indices = @transform_4, window_bounds = array<i64: 1, 2, 32, 96>}, {transform_indices = @transform_5, window_bounds = array<i64: 1, 2, 1, 96>}, {transform_indices = @transform_6, window_bounds = array<i64: 1, 2, 32, 32>}, {transform_indices = @transform_7, window_bounds = array<i64: 1, 2, 1, 32>}, {transform_indices = @transform_8, window_bounds = array<i64: 1, 2, 1, 32>}, {transform_indices = @transform_9, window_bounds = array<i64: 1, 2, 1, 32>}, {transform_indices = @transform_10, window_bounds = array<i64: 1, 2, 32, 64>}, {transform_indices = @transform_11, window_bounds = array<i64: 1, 2, 1, 64>}, {transform_indices = @transform_12, window_bounds = array<i64: 1, 2, 64, 32>}, {transform_indices = @transform_13, window_bounds = array<i64: 1, 2, 1, 32>}, {transform_indices = @transform_14, window_bounds = array<i64: 1, 2, 1, 32>}, {transform_indices = @transform_15, window_bounds = array<i64: 1, 2, 1, 32>}, {transform_indices = @transform_16, window_bounds = array<i64: 1, 32, 32>}, {transform_indices = @transform_17, window_bounds = array<i64: 1, 1, 32>}, {transform_indices = @transform_18, window_bounds = array<i64: 1, 1, 32>}, {transform_indices = @transform_19, window_bounds = array<i64: 1, 1, 32>}, {transform_indices = @transform_20, window_bounds = array<i64: 1, 32, 128>}, {transform_indices = @transform_21, window_bounds = array<i64: 1, 1, 128>}, {transform_indices = @transform_22, window_bounds = array<i64: 1, 16, 128>}]} {
    %c0 = arith.constant 0 : index
    %c0_0 = arith.constant 0 : index
    %c0_1 = arith.constant 0 : index
    %0 = vector.load %arg1[%c0, %c0_0, %c0_1] : memref<1x16x32xf32, #tpu.memory_space<vmem>>, vector<1x16x32xf32>
    %1 = vector.shape_cast %0 : vector<1x16x32xf32> to vector<16x32xf32>
    %c0_2 = arith.constant 0 : index
    %c0_3 = arith.constant 0 : index
    %2 = vector.load %arg2[%c0_2, %c0_3] : memref<16x16xf32, #tpu.memory_space<vmem>>, vector<16x16xf32>
    %c0_4 = arith.constant 0 : index
    %c0_5 = arith.constant 0 : index
    %c0_6 = arith.constant 0 : index
    %3 = vector.load %arg3[%c0_4, %c0_5, %c0_6] : memref<1x1x32xf32, #tpu.memory_space<vmem>>, vector<1x1x32xf32>
    %4 = vector.shape_cast %3 : vector<1x1x32xf32> to vector<1x32xf32>
    %c0_7 = arith.constant 0 : index
    %c0_8 = arith.constant 0 : index
    %c0_9 = arith.constant 0 : index
    %5 = vector.load %arg4[%c0_7, %c0_8, %c0_9] : memref<1x1x32xf32, #tpu.memory_space<vmem>>, vector<1x1x32xf32>
    %6 = vector.shape_cast %5 : vector<1x1x32xf32> to vector<1x32xf32>
    %cst = arith.constant dense<0.000000e+00> : vector<16xf32>
    %7 = vector.multi_reduction <add>, %1, %cst [1] : vector<16x32xf32> to vector<16xf32>
    %8 = vector.shape_cast %7 : vector<16xf32> to vector<16x1xf32>
    %cst_10 = arith.constant 3.200000e+01 : f32
    %9 = vector.broadcast %cst_10 : f32 to vector<16x1xf32>
    %10 = arith.divf %8, %9 : vector<16x1xf32>
    %11 = vector.broadcast %10 : vector<16x1xf32> to vector<16x32xf32>
    %12 = arith.subf %1, %11 : vector<16x32xf32>
    %13 = arith.mulf %12, %12 : vector<16x32xf32>
    %cst_11 = arith.constant dense<0.000000e+00> : vector<16xf32>
    %14 = vector.multi_reduction <add>, %13, %cst_11 [1] : vector<16x32xf32> to vector<16xf32>
    %15 = vector.shape_cast %14 : vector<16xf32> to vector<16x1xf32>
    %cst_12 = arith.constant 3.200000e+01 : f32
    %16 = vector.broadcast %cst_12 : f32 to vector<16x1xf32>
    %17 = arith.divf %15, %16 : vector<16x1xf32>
    %18 = vector.broadcast %10 : vector<16x1xf32> to vector<16x32xf32>
    %19 = arith.subf %1, %18 : vector<16x32xf32>
    %cst_13 = arith.constant 9.99999996E-13 : f32
    %20 = vector.broadcast %cst_13 : f32 to vector<16x1xf32>
    %21 = arith.addf %17, %20 : vector<16x1xf32>
    %22 = math.rsqrt %21 : vector<16x1xf32>
    %23 = vector.broadcast %22 : vector<16x1xf32> to vector<16x32xf32>
    %24 = arith.mulf %19, %23 : vector<16x32xf32>
    %25 = vector.broadcast %4 : vector<1x32xf32> to vector<16x32xf32>
    %26 = arith.mulf %24, %25 : vector<16x32xf32>
    %27 = vector.broadcast %6 : vector<1x32xf32> to vector<16x32xf32>
    %28 = arith.addf %26, %27 : vector<16x32xf32>
    %c0_14 = arith.constant 0 : index
    %c0_15 = arith.constant 0 : index
    %c0_16 = arith.constant 0 : index
    %c0_17 = arith.constant 0 : index
    %29 = vector.load %arg5[%c0_14, %c0_15, %c0_16, %c0_17] : memref<1x2x32x96xf32, #tpu.memory_space<vmem>>, vector<1x1x32x96xf32>
    %30 = vector.shape_cast %29 : vector<1x1x32x96xf32> to vector<32x96xf32>
    %cst_18 = arith.constant dense<0.000000e+00> : vector<16x96xf32>
    %31 = tpu.matmul %28, %30, %cst_18 {dimension_numbers = #tpu.dot_dimension_numbers<[1], [0], [0], [1], [0, 0, 1, 1], [], []>} : vector<16x32xf32>, vector<32x96xf32>, vector<16x96xf32> -> vector<16x96xf32>
    %c0_19 = arith.constant 0 : index
    %c0_20 = arith.constant 0 : index
    %c0_21 = arith.constant 0 : index
    %c0_22 = arith.constant 0 : index
    %32 = vector.load %arg6[%c0_19, %c0_20, %c0_21, %c0_22] : memref<1x2x1x96xf32, #tpu.memory_space<vmem>>, vector<1x1x1x96xf32>
    %33 = vector.shape_cast %32 : vector<1x1x1x96xf32> to vector<1x96xf32>
    %34 = vector.broadcast %33 : vector<1x96xf32> to vector<16x96xf32>
    %35 = arith.addf %31, %34 : vector<16x96xf32>
    %c0_23 = arith.constant 0 : index
    %c0_24 = arith.constant 0 : index
    %c0_25 = arith.constant 0 : index
    %c0_26 = arith.constant 0 : index
    %36 = vector.load %arg7[%c0_23, %c0_24, %c0_25, %c0_26] : memref<1x2x32x32xf32, #tpu.memory_space<vmem>>, vector<1x1x32x32xf32>
    %37 = vector.shape_cast %36 : vector<1x1x32x32xf32> to vector<32x32xf32>
    %c0_27 = arith.constant 0 : index
    %c0_28 = arith.constant 0 : index
    %c0_29 = arith.constant 0 : index
    %c0_30 = arith.constant 0 : index
    %38 = vector.load %arg8[%c0_27, %c0_28, %c0_29, %c0_30] : memref<1x2x1x32xf32, #tpu.memory_space<vmem>>, vector<1x1x1x32xf32>
    %39 = vector.shape_cast %38 : vector<1x1x1x32xf32> to vector<1x32xf32>
    %40 = vector.extract_strided_slice %35 {offsets = [0, 0], sizes = [16, 16], strides = [1, 1]} : vector<16x96xf32> to vector<16x16xf32>
    %41 = vector.extract_strided_slice %35 {offsets = [0, 32], sizes = [16, 16], strides = [1, 1]} : vector<16x96xf32> to vector<16x16xf32>
    %42 = vector.extract_strided_slice %35 {offsets = [0, 64], sizes = [16, 16], strides = [1, 1]} : vector<16x96xf32> to vector<16x16xf32>
    %cst_31 = arith.constant dense<0.000000e+00> : vector<16x16xf32>
    %43 = tpu.matmul %40, %41, %cst_31 {dimension_numbers = #tpu.dot_dimension_numbers<[1], [1], [0], [0], [0, 0, 1, 0], [], []>} : vector<16x16xf32>, vector<16x16xf32>, vector<16x16xf32> -> vector<16x16xf32>
    %cst_32 = arith.constant 2.500000e-01 : f32
    %44 = vector.broadcast %cst_32 : f32 to vector<16x16xf32>
    %45 = arith.mulf %43, %44 : vector<16x16xf32>
    %46 = arith.addf %45, %2 : vector<16x16xf32>
    %cst_33 = arith.constant dense<0xFF800000> : vector<16xf32>
    %47 = vector.multi_reduction <maximumf>, %46, %cst_33 [1] : vector<16x16xf32> to vector<16xf32>
    %48 = vector.shape_cast %47 : vector<16xf32> to vector<16x1xf32>
    %49 = vector.broadcast %48 : vector<16x1xf32> to vector<16x16xf32>
    %50 = arith.subf %46, %49 : vector<16x16xf32>
    %51 = math.exp %50 : vector<16x16xf32>
    %cst_34 = arith.constant dense<0.000000e+00> : vector<16xf32>
    %52 = vector.multi_reduction <add>, %51, %cst_34 [1] : vector<16x16xf32> to vector<16xf32>
    %53 = vector.shape_cast %52 : vector<16xf32> to vector<16x1xf32>
    %54 = tpu.reciprocal %53 {approx = true} : vector<16x1xf32> -> vector<16x1xf32>
    %55 = vector.broadcast %54 : vector<16x1xf32> to vector<16x16xf32>
    %56 = arith.mulf %51, %55 : vector<16x16xf32>
    %cst_35 = arith.constant dense<0.000000e+00> : vector<16x16xf32>
    %57 = tpu.matmul %56, %42, %cst_35 {dimension_numbers = #tpu.dot_dimension_numbers<[1], [0], [0], [1], [0, 0, 1, 1], [], []>} : vector<16x16xf32>, vector<16x16xf32>, vector<16x16xf32> -> vector<16x16xf32>
    %58 = vector.extract_strided_slice %37 {offsets = [0, 0], sizes = [16, 32], strides = [1, 1]} : vector<32x32xf32> to vector<16x32xf32>
    %cst_36 = arith.constant dense<0.000000e+00> : vector<16x32xf32>
    %59 = tpu.matmul %57, %58, %cst_36 {dimension_numbers = #tpu.dot_dimension_numbers<[1], [0], [0], [1], [0, 0, 1, 1], [], []>} : vector<16x16xf32>, vector<16x32xf32>, vector<16x32xf32> -> vector<16x32xf32>
    %60 = vector.broadcast %39 : vector<1x32xf32> to vector<16x32xf32>
    %61 = arith.addf %60, %59 : vector<16x32xf32>
    %62 = vector.extract_strided_slice %35 {offsets = [0, 16], sizes = [16, 16], strides = [1, 1]} : vector<16x96xf32> to vector<16x16xf32>
    %63 = vector.extract_strided_slice %35 {offsets = [0, 48], sizes = [16, 16], strides = [1, 1]} : vector<16x96xf32> to vector<16x16xf32>
    %64 = vector.extract_strided_slice %35 {offsets = [0, 80], sizes = [16, 16], strides = [1, 1]} : vector<16x96xf32> to vector<16x16xf32>
    %cst_37 = arith.constant dense<0.000000e+00> : vector<16x16xf32>
    %65 = tpu.matmul %62, %63, %cst_37 {dimension_numbers = #tpu.dot_dimension_numbers<[1], [1], [0], [0], [0, 0, 1, 0], [], []>} : vector<16x16xf32>, vector<16x16xf32>, vector<16x16xf32> -> vector<16x16xf32>
    %cst_38 = arith.constant 2.500000e-01 : f32
    %66 = vector.broadcast %cst_38 : f32 to vector<16x16xf32>
    %67 = arith.mulf %65, %66 : vector<16x16xf32>
    %68 = arith.addf %67, %2 : vector<16x16xf32>
    %cst_39 = arith.constant dense<0xFF800000> : vector<16xf32>
    %69 = vector.multi_reduction <maximumf>, %68, %cst_39 [1] : vector<16x16xf32> to vector<16xf32>
    %70 = vector.shape_cast %69 : vector<16xf32> to vector<16x1xf32>
    %71 = vector.broadcast %70 : vector<16x1xf32> to vector<16x16xf32>
    %72 = arith.subf %68, %71 : vector<16x16xf32>
    %73 = math.exp %72 : vector<16x16xf32>
    %cst_40 = arith.constant dense<0.000000e+00> : vector<16xf32>
    %74 = vector.multi_reduction <add>, %73, %cst_40 [1] : vector<16x16xf32> to vector<16xf32>
    %75 = vector.shape_cast %74 : vector<16xf32> to vector<16x1xf32>
    %76 = tpu.reciprocal %75 {approx = true} : vector<16x1xf32> -> vector<16x1xf32>
    %77 = vector.broadcast %76 : vector<16x1xf32> to vector<16x16xf32>
    %78 = arith.mulf %73, %77 : vector<16x16xf32>
    %cst_41 = arith.constant dense<0.000000e+00> : vector<16x16xf32>
    %79 = tpu.matmul %78, %64, %cst_41 {dimension_numbers = #tpu.dot_dimension_numbers<[1], [0], [0], [1], [0, 0, 1, 1], [], []>} : vector<16x16xf32>, vector<16x16xf32>, vector<16x16xf32> -> vector<16x16xf32>
    %80 = vector.extract_strided_slice %37 {offsets = [16, 0], sizes = [16, 32], strides = [1, 1]} : vector<32x32xf32> to vector<16x32xf32>
    %cst_42 = arith.constant dense<0.000000e+00> : vector<16x32xf32>
    %81 = tpu.matmul %79, %80, %cst_42 {dimension_numbers = #tpu.dot_dimension_numbers<[1], [0], [0], [1], [0, 0, 1, 1], [], []>} : vector<16x16xf32>, vector<16x32xf32>, vector<16x32xf32> -> vector<16x32xf32>
    %82 = arith.addf %61, %81 : vector<16x32xf32>
    %83 = arith.addf %28, %82 : vector<16x32xf32>
    %c0_43 = arith.constant 0 : index
    %c0_44 = arith.constant 0 : index
    %c0_45 = arith.constant 0 : index
    %c0_46 = arith.constant 0 : index
    %84 = vector.load %arg9[%c0_43, %c0_44, %c0_45, %c0_46] : memref<1x2x1x32xf32, #tpu.memory_space<vmem>>, vector<1x1x1x32xf32>
    %85 = vector.shape_cast %84 : vector<1x1x1x32xf32> to vector<1x32xf32>
    %c0_47 = arith.constant 0 : index
    %c0_48 = arith.constant 0 : index
    %c0_49 = arith.constant 0 : index
    %c0_50 = arith.constant 0 : index
    %86 = vector.load %arg10[%c0_47, %c0_48, %c0_49, %c0_50] : memref<1x2x1x32xf32, #tpu.memory_space<vmem>>, vector<1x1x1x32xf32>
    %87 = vector.shape_cast %86 : vector<1x1x1x32xf32> to vector<1x32xf32>
    %cst_51 = arith.constant dense<0.000000e+00> : vector<16xf32>
    %88 = vector.multi_reduction <add>, %83, %cst_51 [1] : vector<16x32xf32> to vector<16xf32>
    %89 = vector.shape_cast %88 : vector<16xf32> to vector<16x1xf32>
    %cst_52 = arith.constant 3.200000e+01 : f32
    %90 = vector.broadcast %cst_52 : f32 to vector<16x1xf32>
    %91 = arith.divf %89, %90 : vector<16x1xf32>
    %92 = vector.broadcast %91 : vector<16x1xf32> to vector<16x32xf32>
    %93 = arith.subf %83, %92 : vector<16x32xf32>
    %94 = arith.mulf %93, %93 : vector<16x32xf32>
    %cst_53 = arith.constant dense<0.000000e+00> : vector<16xf32>
    %95 = vector.multi_reduction <add>, %94, %cst_53 [1] : vector<16x32xf32> to vector<16xf32>
    %96 = vector.shape_cast %95 : vector<16xf32> to vector<16x1xf32>
    %cst_54 = arith.constant 3.200000e+01 : f32
    %97 = vector.broadcast %cst_54 : f32 to vector<16x1xf32>
    %98 = arith.divf %96, %97 : vector<16x1xf32>
    %99 = vector.broadcast %91 : vector<16x1xf32> to vector<16x32xf32>
    %100 = arith.subf %83, %99 : vector<16x32xf32>
    %cst_55 = arith.constant 9.99999996E-13 : f32
    %101 = vector.broadcast %cst_55 : f32 to vector<16x1xf32>
    %102 = arith.addf %98, %101 : vector<16x1xf32>
    %103 = math.rsqrt %102 : vector<16x1xf32>
    %104 = vector.broadcast %103 : vector<16x1xf32> to vector<16x32xf32>
    %105 = arith.mulf %100, %104 : vector<16x32xf32>
    %106 = vector.broadcast %85 : vector<1x32xf32> to vector<16x32xf32>
    %107 = arith.mulf %105, %106 : vector<16x32xf32>
    %108 = vector.broadcast %87 : vector<1x32xf32> to vector<16x32xf32>
    %109 = arith.addf %107, %108 : vector<16x32xf32>
    %c0_56 = arith.constant 0 : index
    %c0_57 = arith.constant 0 : index
    %c0_58 = arith.constant 0 : index
    %c0_59 = arith.constant 0 : index
    %110 = vector.load %arg11[%c0_56, %c0_57, %c0_58, %c0_59] : memref<1x2x32x64xf32, #tpu.memory_space<vmem>>, vector<1x1x32x64xf32>
    %111 = vector.shape_cast %110 : vector<1x1x32x64xf32> to vector<32x64xf32>
    %cst_60 = arith.constant dense<0.000000e+00> : vector<16x64xf32>
    %112 = tpu.matmul %109, %111, %cst_60 {dimension_numbers = #tpu.dot_dimension_numbers<[1], [0], [0], [1], [0, 0, 1, 1], [], []>} : vector<16x32xf32>, vector<32x64xf32>, vector<16x64xf32> -> vector<16x64xf32>
    %c0_61 = arith.constant 0 : index
    %c0_62 = arith.constant 0 : index
    %c0_63 = arith.constant 0 : index
    %c0_64 = arith.constant 0 : index
    %113 = vector.load %arg12[%c0_61, %c0_62, %c0_63, %c0_64] : memref<1x2x1x64xf32, #tpu.memory_space<vmem>>, vector<1x1x1x64xf32>
    %114 = vector.shape_cast %113 : vector<1x1x1x64xf32> to vector<1x64xf32>
    %115 = vector.broadcast %114 : vector<1x64xf32> to vector<16x64xf32>
    %116 = arith.addf %112, %115 : vector<16x64xf32>
    %cst_65 = arith.constant 5.000000e-01 : f32
    %117 = vector.broadcast %cst_65 : f32 to vector<16x64xf32>
    %118 = arith.mulf %117, %116 : vector<16x64xf32>
    %cst_66 = arith.constant 4.471500e-02 : f32
    %119 = vector.broadcast %cst_66 : f32 to vector<16x64xf32>
    %120 = arith.mulf %119, %116 : vector<16x64xf32>
    %121 = arith.mulf %120, %116 : vector<16x64xf32>
    %122 = arith.mulf %121, %116 : vector<16x64xf32>
    %123 = arith.addf %116, %122 : vector<16x64xf32>
    %cst_67 = arith.constant 0.797884583 : f32
    %124 = vector.broadcast %cst_67 : f32 to vector<16x64xf32>
    %125 = arith.mulf %124, %123 : vector<16x64xf32>
    %126 = math.tanh %125 : vector<16x64xf32>
    %cst_68 = arith.constant 1.000000e+00 : f32
    %127 = vector.broadcast %cst_68 : f32 to vector<16x64xf32>
    %128 = arith.addf %127, %126 : vector<16x64xf32>
    %129 = arith.mulf %118, %128 : vector<16x64xf32>
    %c0_69 = arith.constant 0 : index
    %c0_70 = arith.constant 0 : index
    %c0_71 = arith.constant 0 : index
    %c0_72 = arith.constant 0 : index
    %130 = vector.load %arg13[%c0_69, %c0_70, %c0_71, %c0_72] : memref<1x2x64x32xf32, #tpu.memory_space<vmem>>, vector<1x1x64x32xf32>
    %131 = vector.shape_cast %130 : vector<1x1x64x32xf32> to vector<64x32xf32>
    %cst_73 = arith.constant dense<0.000000e+00> : vector<16x32xf32>
    %132 = tpu.matmul %129, %131, %cst_73 {dimension_numbers = #tpu.dot_dimension_numbers<[1], [0], [0], [1], [0, 0, 1, 1], [], []>} : vector<16x64xf32>, vector<64x32xf32>, vector<16x32xf32> -> vector<16x32xf32>
    %c0_74 = arith.constant 0 : index
    %c0_75 = arith.constant 0 : index
    %c0_76 = arith.constant 0 : index
    %c0_77 = arith.constant 0 : index
    %133 = vector.load %arg14[%c0_74, %c0_75, %c0_76, %c0_77] : memref<1x2x1x32xf32, #tpu.memory_space<vmem>>, vector<1x1x1x32xf32>
    %134 = vector.shape_cast %133 : vector<1x1x1x32xf32> to vector<1x32xf32>
    %135 = vector.broadcast %134 : vector<1x32xf32> to vector<16x32xf32>
    %136 = arith.addf %132, %135 : vector<16x32xf32>
    %137 = arith.addf %109, %136 : vector<16x32xf32>
    %c0_78 = arith.constant 0 : index
    %c0_79 = arith.constant 0 : index
    %c0_80 = arith.constant 0 : index
    %c0_81 = arith.constant 0 : index
    %138 = vector.load %arg15[%c0_78, %c0_79, %c0_80, %c0_81] : memref<1x2x1x32xf32, #tpu.memory_space<vmem>>, vector<1x1x1x32xf32>
    %139 = vector.shape_cast %138 : vector<1x1x1x32xf32> to vector<1x32xf32>
    %c0_82 = arith.constant 0 : index
    %c0_83 = arith.constant 0 : index
    %c0_84 = arith.constant 0 : index
    %c0_85 = arith.constant 0 : index
    %140 = vector.load %arg16[%c0_82, %c0_83, %c0_84, %c0_85] : memref<1x2x1x32xf32, #tpu.memory_space<vmem>>, vector<1x1x1x32xf32>
    %141 = vector.shape_cast %140 : vector<1x1x1x32xf32> to vector<1x32xf32>
    %cst_86 = arith.constant dense<0.000000e+00> : vector<16xf32>
    %142 = vector.multi_reduction <add>, %137, %cst_86 [1] : vector<16x32xf32> to vector<16xf32>
    %143 = vector.shape_cast %142 : vector<16xf32> to vector<16x1xf32>
    %cst_87 = arith.constant 3.200000e+01 : f32
    %144 = vector.broadcast %cst_87 : f32 to vector<16x1xf32>
    %145 = arith.divf %143, %144 : vector<16x1xf32>
    %146 = vector.broadcast %145 : vector<16x1xf32> to vector<16x32xf32>
    %147 = arith.subf %137, %146 : vector<16x32xf32>
    %148 = arith.mulf %147, %147 : vector<16x32xf32>
    %cst_88 = arith.constant dense<0.000000e+00> : vector<16xf32>
    %149 = vector.multi_reduction <add>, %148, %cst_88 [1] : vector<16x32xf32> to vector<16xf32>
    %150 = vector.shape_cast %149 : vector<16xf32> to vector<16x1xf32>
    %cst_89 = arith.constant 3.200000e+01 : f32
    %151 = vector.broadcast %cst_89 : f32 to vector<16x1xf32>
    %152 = arith.divf %150, %151 : vector<16x1xf32>
    %153 = vector.broadcast %145 : vector<16x1xf32> to vector<16x32xf32>
    %154 = arith.subf %137, %153 : vector<16x32xf32>
    %cst_90 = arith.constant 9.99999996E-13 : f32
    %155 = vector.broadcast %cst_90 : f32 to vector<16x1xf32>
    %156 = arith.addf %152, %155 : vector<16x1xf32>
    %157 = math.rsqrt %156 : vector<16x1xf32>
    %158 = vector.broadcast %157 : vector<16x1xf32> to vector<16x32xf32>
    %159 = arith.mulf %154, %158 : vector<16x32xf32>
    %160 = vector.broadcast %139 : vector<1x32xf32> to vector<16x32xf32>
    %161 = arith.mulf %159, %160 : vector<16x32xf32>
    %162 = vector.broadcast %141 : vector<1x32xf32> to vector<16x32xf32>
    %163 = arith.addf %161, %162 : vector<16x32xf32>
    %c0_91 = arith.constant 0 : index
    %c1 = arith.constant 1 : index
    %c0_92 = arith.constant 0 : index
    %c0_93 = arith.constant 0 : index
    %164 = vector.load %arg5[%c0_91, %c1, %c0_92, %c0_93] : memref<1x2x32x96xf32, #tpu.memory_space<vmem>>, vector<1x1x32x96xf32>
    %165 = vector.shape_cast %164 : vector<1x1x32x96xf32> to vector<32x96xf32>
    %cst_94 = arith.constant dense<0.000000e+00> : vector<16x96xf32>
    %166 = tpu.matmul %163, %165, %cst_94 {dimension_numbers = #tpu.dot_dimension_numbers<[1], [0], [0], [1], [0, 0, 1, 1], [], []>} : vector<16x32xf32>, vector<32x96xf32>, vector<16x96xf32> -> vector<16x96xf32>
    %c0_95 = arith.constant 0 : index
    %c1_96 = arith.constant 1 : index
    %c0_97 = arith.constant 0 : index
    %c0_98 = arith.constant 0 : index
    %167 = vector.load %arg6[%c0_95, %c1_96, %c0_97, %c0_98] : memref<1x2x1x96xf32, #tpu.memory_space<vmem>>, vector<1x1x1x96xf32>
    %168 = vector.shape_cast %167 : vector<1x1x1x96xf32> to vector<1x96xf32>
    %169 = vector.broadcast %168 : vector<1x96xf32> to vector<16x96xf32>
    %170 = arith.addf %166, %169 : vector<16x96xf32>
    %c0_99 = arith.constant 0 : index
    %c1_100 = arith.constant 1 : index
    %c0_101 = arith.constant 0 : index
    %c0_102 = arith.constant 0 : index
    %171 = vector.load %arg7[%c0_99, %c1_100, %c0_101, %c0_102] : memref<1x2x32x32xf32, #tpu.memory_space<vmem>>, vector<1x1x32x32xf32>
    %172 = vector.shape_cast %171 : vector<1x1x32x32xf32> to vector<32x32xf32>
    %c0_103 = arith.constant 0 : index
    %c1_104 = arith.constant 1 : index
    %c0_105 = arith.constant 0 : index
    %c0_106 = arith.constant 0 : index
    %173 = vector.load %arg8[%c0_103, %c1_104, %c0_105, %c0_106] : memref<1x2x1x32xf32, #tpu.memory_space<vmem>>, vector<1x1x1x32xf32>
    %174 = vector.shape_cast %173 : vector<1x1x1x32xf32> to vector<1x32xf32>
    %175 = vector.extract_strided_slice %170 {offsets = [0, 0], sizes = [16, 16], strides = [1, 1]} : vector<16x96xf32> to vector<16x16xf32>
    %176 = vector.extract_strided_slice %170 {offsets = [0, 32], sizes = [16, 16], strides = [1, 1]} : vector<16x96xf32> to vector<16x16xf32>
    %177 = vector.extract_strided_slice %170 {offsets = [0, 64], sizes = [16, 16], strides = [1, 1]} : vector<16x96xf32> to vector<16x16xf32>
    %cst_107 = arith.constant dense<0.000000e+00> : vector<16x16xf32>
    %178 = tpu.matmul %175, %176, %cst_107 {dimension_numbers = #tpu.dot_dimension_numbers<[1], [1], [0], [0], [0, 0, 1, 0], [], []>} : vector<16x16xf32>, vector<16x16xf32>, vector<16x16xf32> -> vector<16x16xf32>
    %cst_108 = arith.constant 2.500000e-01 : f32
    %179 = vector.broadcast %cst_108 : f32 to vector<16x16xf32>
    %180 = arith.mulf %178, %179 : vector<16x16xf32>
    %181 = arith.addf %180, %2 : vector<16x16xf32>
    %cst_109 = arith.constant dense<0xFF800000> : vector<16xf32>
    %182 = vector.multi_reduction <maximumf>, %181, %cst_109 [1] : vector<16x16xf32> to vector<16xf32>
    %183 = vector.shape_cast %182 : vector<16xf32> to vector<16x1xf32>
    %184 = vector.broadcast %183 : vector<16x1xf32> to vector<16x16xf32>
    %185 = arith.subf %181, %184 : vector<16x16xf32>
    %186 = math.exp %185 : vector<16x16xf32>
    %cst_110 = arith.constant dense<0.000000e+00> : vector<16xf32>
    %187 = vector.multi_reduction <add>, %186, %cst_110 [1] : vector<16x16xf32> to vector<16xf32>
    %188 = vector.shape_cast %187 : vector<16xf32> to vector<16x1xf32>
    %189 = tpu.reciprocal %188 {approx = true} : vector<16x1xf32> -> vector<16x1xf32>
    %190 = vector.broadcast %189 : vector<16x1xf32> to vector<16x16xf32>
    %191 = arith.mulf %186, %190 : vector<16x16xf32>
    %cst_111 = arith.constant dense<0.000000e+00> : vector<16x16xf32>
    %192 = tpu.matmul %191, %177, %cst_111 {dimension_numbers = #tpu.dot_dimension_numbers<[1], [0], [0], [1], [0, 0, 1, 1], [], []>} : vector<16x16xf32>, vector<16x16xf32>, vector<16x16xf32> -> vector<16x16xf32>
    %193 = vector.extract_strided_slice %172 {offsets = [0, 0], sizes = [16, 32], strides = [1, 1]} : vector<32x32xf32> to vector<16x32xf32>
    %cst_112 = arith.constant dense<0.000000e+00> : vector<16x32xf32>
    %194 = tpu.matmul %192, %193, %cst_112 {dimension_numbers = #tpu.dot_dimension_numbers<[1], [0], [0], [1], [0, 0, 1, 1], [], []>} : vector<16x16xf32>, vector<16x32xf32>, vector<16x32xf32> -> vector<16x32xf32>
    %195 = vector.broadcast %174 : vector<1x32xf32> to vector<16x32xf32>
    %196 = arith.addf %195, %194 : vector<16x32xf32>
    %197 = vector.extract_strided_slice %170 {offsets = [0, 16], sizes = [16, 16], strides = [1, 1]} : vector<16x96xf32> to vector<16x16xf32>
    %198 = vector.extract_strided_slice %170 {offsets = [0, 48], sizes = [16, 16], strides = [1, 1]} : vector<16x96xf32> to vector<16x16xf32>
    %199 = vector.extract_strided_slice %170 {offsets = [0, 80], sizes = [16, 16], strides = [1, 1]} : vector<16x96xf32> to vector<16x16xf32>
    %cst_113 = arith.constant dense<0.000000e+00> : vector<16x16xf32>
    %200 = tpu.matmul %197, %198, %cst_113 {dimension_numbers = #tpu.dot_dimension_numbers<[1], [1], [0], [0], [0, 0, 1, 0], [], []>} : vector<16x16xf32>, vector<16x16xf32>, vector<16x16xf32> -> vector<16x16xf32>
    %cst_114 = arith.constant 2.500000e-01 : f32
    %201 = vector.broadcast %cst_114 : f32 to vector<16x16xf32>
    %202 = arith.mulf %200, %201 : vector<16x16xf32>
    %203 = arith.addf %202, %2 : vector<16x16xf32>
    %cst_115 = arith.constant dense<0xFF800000> : vector<16xf32>
    %204 = vector.multi_reduction <maximumf>, %203, %cst_115 [1] : vector<16x16xf32> to vector<16xf32>
    %205 = vector.shape_cast %204 : vector<16xf32> to vector<16x1xf32>
    %206 = vector.broadcast %205 : vector<16x1xf32> to vector<16x16xf32>
    %207 = arith.subf %203, %206 : vector<16x16xf32>
    %208 = math.exp %207 : vector<16x16xf32>
    %cst_116 = arith.constant dense<0.000000e+00> : vector<16xf32>
    %209 = vector.multi_reduction <add>, %208, %cst_116 [1] : vector<16x16xf32> to vector<16xf32>
    %210 = vector.shape_cast %209 : vector<16xf32> to vector<16x1xf32>
    %211 = tpu.reciprocal %210 {approx = true} : vector<16x1xf32> -> vector<16x1xf32>
    %212 = vector.broadcast %211 : vector<16x1xf32> to vector<16x16xf32>
    %213 = arith.mulf %208, %212 : vector<16x16xf32>
    %cst_117 = arith.constant dense<0.000000e+00> : vector<16x16xf32>
    %214 = tpu.matmul %213, %199, %cst_117 {dimension_numbers = #tpu.dot_dimension_numbers<[1], [0], [0], [1], [0, 0, 1, 1], [], []>} : vector<16x16xf32>, vector<16x16xf32>, vector<16x16xf32> -> vector<16x16xf32>
    %215 = vector.extract_strided_slice %172 {offsets = [16, 0], sizes = [16, 32], strides = [1, 1]} : vector<32x32xf32> to vector<16x32xf32>
    %cst_118 = arith.constant dense<0.000000e+00> : vector<16x32xf32>
    %216 = tpu.matmul %214, %215, %cst_118 {dimension_numbers = #tpu.dot_dimension_numbers<[1], [0], [0], [1], [0, 0, 1, 1], [], []>} : vector<16x16xf32>, vector<16x32xf32>, vector<16x32xf32> -> vector<16x32xf32>
    %217 = arith.addf %196, %216 : vector<16x32xf32>
    %218 = arith.addf %163, %217 : vector<16x32xf32>
    %c0_119 = arith.constant 0 : index
    %c1_120 = arith.constant 1 : index
    %c0_121 = arith.constant 0 : index
    %c0_122 = arith.constant 0 : index
    %219 = vector.load %arg9[%c0_119, %c1_120, %c0_121, %c0_122] : memref<1x2x1x32xf32, #tpu.memory_space<vmem>>, vector<1x1x1x32xf32>
    %220 = vector.shape_cast %219 : vector<1x1x1x32xf32> to vector<1x32xf32>
    %c0_123 = arith.constant 0 : index
    %c1_124 = arith.constant 1 : index
    %c0_125 = arith.constant 0 : index
    %c0_126 = arith.constant 0 : index
    %221 = vector.load %arg10[%c0_123, %c1_124, %c0_125, %c0_126] : memref<1x2x1x32xf32, #tpu.memory_space<vmem>>, vector<1x1x1x32xf32>
    %222 = vector.shape_cast %221 : vector<1x1x1x32xf32> to vector<1x32xf32>
    %cst_127 = arith.constant dense<0.000000e+00> : vector<16xf32>
    %223 = vector.multi_reduction <add>, %218, %cst_127 [1] : vector<16x32xf32> to vector<16xf32>
    %224 = vector.shape_cast %223 : vector<16xf32> to vector<16x1xf32>
    %cst_128 = arith.constant 3.200000e+01 : f32
    %225 = vector.broadcast %cst_128 : f32 to vector<16x1xf32>
    %226 = arith.divf %224, %225 : vector<16x1xf32>
    %227 = vector.broadcast %226 : vector<16x1xf32> to vector<16x32xf32>
    %228 = arith.subf %218, %227 : vector<16x32xf32>
    %229 = arith.mulf %228, %228 : vector<16x32xf32>
    %cst_129 = arith.constant dense<0.000000e+00> : vector<16xf32>
    %230 = vector.multi_reduction <add>, %229, %cst_129 [1] : vector<16x32xf32> to vector<16xf32>
    %231 = vector.shape_cast %230 : vector<16xf32> to vector<16x1xf32>
    %cst_130 = arith.constant 3.200000e+01 : f32
    %232 = vector.broadcast %cst_130 : f32 to vector<16x1xf32>
    %233 = arith.divf %231, %232 : vector<16x1xf32>
    %234 = vector.broadcast %226 : vector<16x1xf32> to vector<16x32xf32>
    %235 = arith.subf %218, %234 : vector<16x32xf32>
    %cst_131 = arith.constant 9.99999996E-13 : f32
    %236 = vector.broadcast %cst_131 : f32 to vector<16x1xf32>
    %237 = arith.addf %233, %236 : vector<16x1xf32>
    %238 = math.rsqrt %237 : vector<16x1xf32>
    %239 = vector.broadcast %238 : vector<16x1xf32> to vector<16x32xf32>
    %240 = arith.mulf %235, %239 : vector<16x32xf32>
    %241 = vector.broadcast %220 : vector<1x32xf32> to vector<16x32xf32>
    %242 = arith.mulf %240, %241 : vector<16x32xf32>
    %243 = vector.broadcast %222 : vector<1x32xf32> to vector<16x32xf32>
    %244 = arith.addf %242, %243 : vector<16x32xf32>
    %c0_132 = arith.constant 0 : index
    %c1_133 = arith.constant 1 : index
    %c0_134 = arith.constant 0 : index
    %c0_135 = arith.constant 0 : index
    %245 = vector.load %arg11[%c0_132, %c1_133, %c0_134, %c0_135] : memref<1x2x32x64xf32, #tpu.memory_space<vmem>>, vector<1x1x32x64xf32>
    %246 = vector.shape_cast %245 : vector<1x1x32x64xf32> to vector<32x64xf32>
    %cst_136 = arith.constant dense<0.000000e+00> : vector<16x64xf32>
    %247 = tpu.matmul %244, %246, %cst_136 {dimension_numbers = #tpu.dot_dimension_numbers<[1], [0], [0], [1], [0, 0, 1, 1], [], []>} : vector<16x32xf32>, vector<32x64xf32>, vector<16x64xf32> -> vector<16x64xf32>
    %c0_137 = arith.constant 0 : index
    %c1_138 = arith.constant 1 : index
    %c0_139 = arith.constant 0 : index
    %c0_140 = arith.constant 0 : index
    %248 = vector.load %arg12[%c0_137, %c1_138, %c0_139, %c0_140] : memref<1x2x1x64xf32, #tpu.memory_space<vmem>>, vector<1x1x1x64xf32>
    %249 = vector.shape_cast %248 : vector<1x1x1x64xf32> to vector<1x64xf32>
    %250 = vector.broadcast %249 : vector<1x64xf32> to vector<16x64xf32>
    %251 = arith.addf %247, %250 : vector<16x64xf32>
    %cst_141 = arith.constant 5.000000e-01 : f32
    %252 = vector.broadcast %cst_141 : f32 to vector<16x64xf32>
    %253 = arith.mulf %252, %251 : vector<16x64xf32>
    %cst_142 = arith.constant 4.471500e-02 : f32
    %254 = vector.broadcast %cst_142 : f32 to vector<16x64xf32>
    %255 = arith.mulf %254, %251 : vector<16x64xf32>
    %256 = arith.mulf %255, %251 : vector<16x64xf32>
    %257 = arith.mulf %256, %251 : vector<16x64xf32>
    %258 = arith.addf %251, %257 : vector<16x64xf32>
    %cst_143 = arith.constant 0.797884583 : f32
    %259 = vector.broadcast %cst_143 : f32 to vector<16x64xf32>
    %260 = arith.mulf %259, %258 : vector<16x64xf32>
    %261 = math.tanh %260 : vector<16x64xf32>
    %cst_144 = arith.constant 1.000000e+00 : f32
    %262 = vector.broadcast %cst_144 : f32 to vector<16x64xf32>
    %263 = arith.addf %262, %261 : vector<16x64xf32>
    %264 = arith.mulf %253, %263 : vector<16x64xf32>
    %c0_145 = arith.constant 0 : index
    %c1_146 = arith.constant 1 : index
    %c0_147 = arith.constant 0 : index
    %c0_148 = arith.constant 0 : index
    %265 = vector.load %arg13[%c0_145, %c1_146, %c0_147, %c0_148] : memref<1x2x64x32xf32, #tpu.memory_space<vmem>>, vector<1x1x64x32xf32>
    %266 = vector.shape_cast %265 : vector<1x1x64x32xf32> to vector<64x32xf32>
    %cst_149 = arith.constant dense<0.000000e+00> : vector<16x32xf32>
    %267 = tpu.matmul %264, %266, %cst_149 {dimension_numbers = #tpu.dot_dimension_numbers<[1], [0], [0], [1], [0, 0, 1, 1], [], []>} : vector<16x64xf32>, vector<64x32xf32>, vector<16x32xf32> -> vector<16x32xf32>
    %c0_150 = arith.constant 0 : index
    %c1_151 = arith.constant 1 : index
    %c0_152 = arith.constant 0 : index
    %c0_153 = arith.constant 0 : index
    %268 = vector.load %arg14[%c0_150, %c1_151, %c0_152, %c0_153] : memref<1x2x1x32xf32, #tpu.memory_space<vmem>>, vector<1x1x1x32xf32>
    %269 = vector.shape_cast %268 : vector<1x1x1x32xf32> to vector<1x32xf32>
    %270 = vector.broadcast %269 : vector<1x32xf32> to vector<16x32xf32>
    %271 = arith.addf %267, %270 : vector<16x32xf32>
    %272 = arith.addf %244, %271 : vector<16x32xf32>
    %c0_154 = arith.constant 0 : index
    %c1_155 = arith.constant 1 : index
    %c0_156 = arith.constant 0 : index
    %c0_157 = arith.constant 0 : index
    %273 = vector.load %arg15[%c0_154, %c1_155, %c0_156, %c0_157] : memref<1x2x1x32xf32, #tpu.memory_space<vmem>>, vector<1x1x1x32xf32>
    %274 = vector.shape_cast %273 : vector<1x1x1x32xf32> to vector<1x32xf32>
    %c0_158 = arith.constant 0 : index
    %c1_159 = arith.constant 1 : index
    %c0_160 = arith.constant 0 : index
    %c0_161 = arith.constant 0 : index
    %275 = vector.load %arg16[%c0_158, %c1_159, %c0_160, %c0_161] : memref<1x2x1x32xf32, #tpu.memory_space<vmem>>, vector<1x1x1x32xf32>
    %276 = vector.shape_cast %275 : vector<1x1x1x32xf32> to vector<1x32xf32>
    %cst_162 = arith.constant dense<0.000000e+00> : vector<16xf32>
    %277 = vector.multi_reduction <add>, %272, %cst_162 [1] : vector<16x32xf32> to vector<16xf32>
    %278 = vector.shape_cast %277 : vector<16xf32> to vector<16x1xf32>
    %cst_163 = arith.constant 3.200000e+01 : f32
    %279 = vector.broadcast %cst_163 : f32 to vector<16x1xf32>
    %280 = arith.divf %278, %279 : vector<16x1xf32>
    %281 = vector.broadcast %280 : vector<16x1xf32> to vector<16x32xf32>
    %282 = arith.subf %272, %281 : vector<16x32xf32>
    %283 = arith.mulf %282, %282 : vector<16x32xf32>
    %cst_164 = arith.constant dense<0.000000e+00> : vector<16xf32>
    %284 = vector.multi_reduction <add>, %283, %cst_164 [1] : vector<16x32xf32> to vector<16xf32>
    %285 = vector.shape_cast %284 : vector<16xf32> to vector<16x1xf32>
    %cst_165 = arith.constant 3.200000e+01 : f32
    %286 = vector.broadcast %cst_165 : f32 to vector<16x1xf32>
    %287 = arith.divf %285, %286 : vector<16x1xf32>
    %288 = vector.broadcast %280 : vector<16x1xf32> to vector<16x32xf32>
    %289 = arith.subf %272, %288 : vector<16x32xf32>
    %cst_166 = arith.constant 9.99999996E-13 : f32
    %290 = vector.broadcast %cst_166 : f32 to vector<16x1xf32>
    %291 = arith.addf %287, %290 : vector<16x1xf32>
    %292 = math.rsqrt %291 : vector<16x1xf32>
    %293 = vector.broadcast %292 : vector<16x1xf32> to vector<16x32xf32>
    %294 = arith.mulf %289, %293 : vector<16x32xf32>
    %295 = vector.broadcast %274 : vector<1x32xf32> to vector<16x32xf32>
    %296 = arith.mulf %294, %295 : vector<16x32xf32>
    %297 = vector.broadcast %276 : vector<1x32xf32> to vector<16x32xf32>
    %298 = arith.addf %296, %297 : vector<16x32xf32>
    %c0_167 = arith.constant 0 : index
    %c0_168 = arith.constant 0 : index
    %c0_169 = arith.constant 0 : index
    %299 = vector.load %arg17[%c0_167, %c0_168, %c0_169] : memref<1x32x32xf32, #tpu.memory_space<vmem>>, vector<1x32x32xf32>
    %300 = vector.shape_cast %299 : vector<1x32x32xf32> to vector<32x32xf32>
    %cst_170 = arith.constant dense<0.000000e+00> : vector<16x32xf32>
    %301 = tpu.matmul %298, %300, %cst_170 {dimension_numbers = #tpu.dot_dimension_numbers<[1], [0], [0], [1], [0, 0, 1, 1], [], []>} : vector<16x32xf32>, vector<32x32xf32>, vector<16x32xf32> -> vector<16x32xf32>
    %c0_171 = arith.constant 0 : index
    %c0_172 = arith.constant 0 : index
    %c0_173 = arith.constant 0 : index
    %302 = vector.load %arg18[%c0_171, %c0_172, %c0_173] : memref<1x1x32xf32, #tpu.memory_space<vmem>>, vector<1x1x32xf32>
    %303 = vector.shape_cast %302 : vector<1x1x32xf32> to vector<1x32xf32>
    %304 = vector.broadcast %303 : vector<1x32xf32> to vector<16x32xf32>
    %305 = arith.addf %301, %304 : vector<16x32xf32>
    %cst_174 = arith.constant 5.000000e-01 : f32
    %306 = vector.broadcast %cst_174 : f32 to vector<16x32xf32>
    %307 = arith.mulf %306, %305 : vector<16x32xf32>
    %cst_175 = arith.constant 4.471500e-02 : f32
    %308 = vector.broadcast %cst_175 : f32 to vector<16x32xf32>
    %309 = arith.mulf %308, %305 : vector<16x32xf32>
    %310 = arith.mulf %309, %305 : vector<16x32xf32>
    %311 = arith.mulf %310, %305 : vector<16x32xf32>
    %312 = arith.addf %305, %311 : vector<16x32xf32>
    %cst_176 = arith.constant 0.797884583 : f32
    %313 = vector.broadcast %cst_176 : f32 to vector<16x32xf32>
    %314 = arith.mulf %313, %312 : vector<16x32xf32>
    %315 = math.tanh %314 : vector<16x32xf32>
    %cst_177 = arith.constant 1.000000e+00 : f32
    %316 = vector.broadcast %cst_177 : f32 to vector<16x32xf32>
    %317 = arith.addf %316, %315 : vector<16x32xf32>
    %318 = arith.mulf %307, %317 : vector<16x32xf32>
    %c0_178 = arith.constant 0 : index
    %c0_179 = arith.constant 0 : index
    %c0_180 = arith.constant 0 : index
    %319 = vector.load %arg19[%c0_178, %c0_179, %c0_180] : memref<1x1x32xf32, #tpu.memory_space<vmem>>, vector<1x1x32xf32>
    %320 = vector.shape_cast %319 : vector<1x1x32xf32> to vector<1x32xf32>
    %c0_181 = arith.constant 0 : index
    %c0_182 = arith.constant 0 : index
    %c0_183 = arith.constant 0 : index
    %321 = vector.load %arg20[%c0_181, %c0_182, %c0_183] : memref<1x1x32xf32, #tpu.memory_space<vmem>>, vector<1x1x32xf32>
    %322 = vector.shape_cast %321 : vector<1x1x32xf32> to vector<1x32xf32>
    %cst_184 = arith.constant dense<0.000000e+00> : vector<16xf32>
    %323 = vector.multi_reduction <add>, %318, %cst_184 [1] : vector<16x32xf32> to vector<16xf32>
    %324 = vector.shape_cast %323 : vector<16xf32> to vector<16x1xf32>
    %cst_185 = arith.constant 3.200000e+01 : f32
    %325 = vector.broadcast %cst_185 : f32 to vector<16x1xf32>
    %326 = arith.divf %324, %325 : vector<16x1xf32>
    %327 = vector.broadcast %326 : vector<16x1xf32> to vector<16x32xf32>
    %328 = arith.subf %318, %327 : vector<16x32xf32>
    %329 = arith.mulf %328, %328 : vector<16x32xf32>
    %cst_186 = arith.constant dense<0.000000e+00> : vector<16xf32>
    %330 = vector.multi_reduction <add>, %329, %cst_186 [1] : vector<16x32xf32> to vector<16xf32>
    %331 = vector.shape_cast %330 : vector<16xf32> to vector<16x1xf32>
    %cst_187 = arith.constant 3.200000e+01 : f32
    %332 = vector.broadcast %cst_187 : f32 to vector<16x1xf32>
    %333 = arith.divf %331, %332 : vector<16x1xf32>
    %334 = vector.broadcast %326 : vector<16x1xf32> to vector<16x32xf32>
    %335 = arith.subf %318, %334 : vector<16x32xf32>
    %cst_188 = arith.constant 9.99999996E-13 : f32
    %336 = vector.broadcast %cst_188 : f32 to vector<16x1xf32>
    %337 = arith.addf %333, %336 : vector<16x1xf32>
    %338 = math.rsqrt %337 : vector<16x1xf32>
    %339 = vector.broadcast %338 : vector<16x1xf32> to vector<16x32xf32>
    %340 = arith.mulf %335, %339 : vector<16x32xf32>
    %341 = vector.broadcast %320 : vector<1x32xf32> to vector<16x32xf32>
    %342 = arith.mulf %340, %341 : vector<16x32xf32>
    %343 = vector.broadcast %322 : vector<1x32xf32> to vector<16x32xf32>
    %344 = arith.addf %342, %343 : vector<16x32xf32>
    %c0_189 = arith.constant 0 : index
    %c0_190 = arith.constant 0 : index
    %c0_191 = arith.constant 0 : index
    %345 = vector.load %arg21[%c0_189, %c0_190, %c0_191] : memref<1x32x128xf32, #tpu.memory_space<vmem>>, vector<1x32x128xf32>
    %346 = vector.shape_cast %345 : vector<1x32x128xf32> to vector<32x128xf32>
    %cst_192 = arith.constant dense<0.000000e+00> : vector<16x128xf32>
    %347 = tpu.matmul %344, %346, %cst_192 {dimension_numbers = #tpu.dot_dimension_numbers<[1], [0], [0], [1], [0, 0, 1, 1], [], []>} : vector<16x32xf32>, vector<32x128xf32>, vector<16x128xf32> -> vector<16x128xf32>
    %c0_193 = arith.constant 0 : index
    %c0_194 = arith.constant 0 : index
    %c0_195 = arith.constant 0 : index
    %348 = vector.load %arg22[%c0_193, %c0_194, %c0_195] : memref<1x1x128xf32, #tpu.memory_space<vmem>>, vector<1x1x128xf32>
    %349 = vector.shape_cast %348 : vector<1x1x128xf32> to vector<1x128xf32>
    %350 = vector.broadcast %349 : vector<1x128xf32> to vector<16x128xf32>
    %351 = arith.addf %347, %350 : vector<16x128xf32>
    %cst_196 = arith.constant dense<0xFF800000> : vector<16xf32>
    %352 = vector.multi_reduction <maximumf>, %351, %cst_196 [1] : vector<16x128xf32> to vector<16xf32>
    %353 = vector.shape_cast %352 : vector<16xf32> to vector<16x1xf32>
    %354 = vector.broadcast %353 : vector<16x1xf32> to vector<16x128xf32>
    %355 = arith.subf %351, %354 : vector<16x128xf32>
    %356 = math.exp %355 : vector<16x128xf32>
    %cst_197 = arith.constant dense<0.000000e+00> : vector<16xf32>
    %357 = vector.multi_reduction <add>, %356, %cst_197 [1] : vector<16x128xf32> to vector<16xf32>
    %358 = vector.shape_cast %357 : vector<16xf32> to vector<16x1xf32>
    %359 = vector.broadcast %358 : vector<16x1xf32> to vector<16x128xf32>
    %360 = arith.divf %356, %359 : vector<16x128xf32>
    %c0_198 = arith.constant 0 : index
    %c0_199 = arith.constant 0 : index
    %c0_200 = arith.constant 0 : index
    %361 = vector.load %arg23[%c0_198, %c0_199, %c0_200] : memref<1x16x128xf32, #tpu.memory_space<vmem>>, vector<1x16x128xf32>
    %362 = vector.shape_cast %361 : vector<1x16x128xf32> to vector<16x128xf32>
    %363 = vector.shape_cast %360 : vector<16x128xf32> to vector<1x16x128xf32>
    tpu.vector_store %arg23[%c0_198, %c0_199, %c0_200], %363 {strides = array<i32>} : memref<1x16x128xf32, #tpu.memory_space<vmem>>, vector<1x16x128xf32>,
    return
  }
  func.func @transform_0(%arg0: i32) -> (i32, i32, i32) {
    %c0_i32 = arith.constant 0 : i32
    %c0_i32_0 = arith.constant 0 : i32
    %c0_i32_1 = arith.constant 0 : i32
    return %arg0, %c0_i32, %c0_i32_0 : i32, i32, i32
  }
  func.func @transform_1(%arg0: i32) -> (i32, i32) {
    %c0_i32 = arith.constant 0 : i32
    %c0_i32_0 = arith.constant 0 : i32
    %c0_i32_1 = arith.constant 0 : i32
    return %c0_i32, %c0_i32_0 : i32, i32
  }
  func.func @transform_2(%arg0: i32) -> (i32, i32, i32) {
    %c0_i32 = arith.constant 0 : i32
    %c0_i32_0 = arith.constant 0 : i32
    %c0_i32_1 = arith.constant 0 : i32
    return %arg0, %c0_i32, %c0_i32_0 : i32, i32, i32
  }
  func.func @transform_3(%arg0: i32) -> (i32, i32, i32) {
    %c0_i32 = arith.constant 0 : i32
    %c0_i32_0 = arith.constant 0 : i32
    %c0_i32_1 = arith.constant 0 : i32
    return %arg0, %c0_i32, %c0_i32_0 : i32, i32, i32
  }
  func.func @transform_4(%arg0: i32) -> (i32, i32, i32, i32) {
    %c0_i32 = arith.constant 0 : i32
    %c0_i32_0 = arith.constant 0 : i32
    %c0_i32_1 = arith.constant 0 : i32
    %c0_i32_2 = arith.constant 0 : i32
    return %arg0, %c0_i32, %c0_i32_0, %c0_i32_1 : i32, i32, i32, i32
  }
  func.func @transform_5(%arg0: i32) -> (i32, i32, i32, i32) {
    %c0_i32 = arith.constant 0 : i32
    %c0_i32_0 = arith.constant 0 : i32
    %c0_i32_1 = arith.constant 0 : i32
    %c0_i32_2 = arith.constant 0 : i32
    return %arg0, %c0_i32, %c0_i32_0, %c0_i32_1 : i32, i32, i32, i32
  }
  func.func @transform_6(%arg0: i32) -> (i32, i32, i32, i32) {
    %c0_i32 = arith.constant 0 : i32
    %c0_i32_0 = arith.constant 0 : i32
    %c0_i32_1 = arith.constant 0 : i32
    %c0_i32_2 = arith.constant 0 : i32
    return %arg0, %c0_i32, %c0_i32_0, %c0_i32_1 : i32, i32, i32, i32
  }
  func.func @transform_7(%arg0: i32) -> (i32, i32, i32, i32) {
    %c0_i32 = arith.constant 0 : i32
    %c0_i32_0 = arith.constant 0 : i32
    %c0_i32_1 = arith.constant 0 : i32
    %c0_i32_2 = arith.constant 0 : i32
    return %arg0, %c0_i32, %c0_i32_0, %c0_i32_1 : i32, i32, i32, i32
  }
  func.func @transform_8(%arg0: i32) -> (i32, i32, i32, i32) {
    %c0_i32 = arith.constant 0 : i32
    %c0_i32_0 = arith.constant 0 : i32
    %c0_i32_1 = arith.constant 0 : i32
    %c0_i32_2 = arith.constant 0 : i32
    return %arg0, %c0_i32, %c0_i32_0, %c0_i32_1 : i32, i32, i32, i32
  }
  func.func @transform_9(%arg0: i32) -> (i32, i32, i32, i32) {
    %c0_i32 = arith.constant 0 : i32
    %c0_i32_0 = arith.constant 0 : i32
    %c0_i32_1 = arith.constant 0 : i32
    %c0_i32_2 = arith.constant 0 : i32
    return %arg0, %c0_i32, %c0_i32_0, %c0_i32_1 : i32, i32, i32, i32
  }
  func.func @transform_10(%arg0: i32) -> (i32, i32, i32, i32) {
    %c0_i32 = arith.constant 0 : i32
    %c0_i32_0 = arith.constant 0 : i32
    %c0_i32_1 = arith.constant 0 : i32
    %c0_i32_2 = arith.constant 0 : i32
    return %arg0, %c0_i32, %c0_i32_0, %c0_i32_1 : i32, i32, i32, i32
  }
  func.func @transform_11(%arg0: i32) -> (i32, i32, i32, i32) {
    %c0_i32 = arith.constant 0 : i32
    %c0_i32_0 = arith.constant 0 : i32
    %c0_i32_1 = arith.constant 0 : i32
    %c0_i32_2 = arith.constant 0 : i32
    return %arg0, %c0_i32, %c0_i32_0, %c0_i32_1 : i32, i32, i32, i32
  }
  func.func @transform_12(%arg0: i32) -> (i32, i32, i32, i32) {
    %c0_i32 = arith.constant 0 : i32
    %c0_i32_0 = arith.constant 0 : i32
    %c0_i32_1 = arith.constant 0 : i32
    %c0_i32_2 = arith.constant 0 : i32
    return %arg0, %c0_i32, %c0_i32_0, %c0_i32_1 : i32, i32, i32, i32
  }
  func.func @transform_13(%arg0: i32) -> (i32, i32, i32, i32) {
    %c0_i32 = arith.constant 0 : i32
    %c0_i32_0 = arith.constant 0 : i32
    %c0_i32_1 = arith.constant 0 : i32
    %c0_i32_2 = arith.constant 0 : i32
    return %arg0, %c0_i32, %c0_i32_0, %c0_i32_1 : i32, i32, i32, i32
  }
  func.func @transform_14(%arg0: i32) -> (i32, i32, i32, i32) {
    %c0_i32 = arith.constant 0 : i32
    %c0_i32_0 = arith.constant 0 : i32
    %c0_i32_1 = arith.constant 0 : i32
    %c0_i32_2 = arith.constant 0 : i32
    return %arg0, %c0_i32, %c0_i32_0, %c0_i32_1 : i32, i32, i32, i32
  }
  func.func @transform_15(%arg0: i32) -> (i32, i32, i32, i32) {
    %c0_i32 = arith.constant 0 : i32
    %c0_i32_0 = arith.constant 0 : i32
    %c0_i32_1 = arith.constant 0 : i32
    %c0_i32_2 = arith.constant 0 : i32
    return %arg0, %c0_i32, %c0_i32_0, %c0_i32_1 : i32, i32, i32, i32
  }
  func.func @transform_16(%arg0: i32) -> (i32, i32, i32) {
    %c0_i32 = arith.constant 0 : i32
    %c0_i32_0 = arith.constant 0 : i32
    %c0_i32_1 = arith.constant 0 : i32
    return %arg0, %c0_i32, %c0_i32_0 : i32, i32, i32
  }
  func.func @transform_17(%arg0: i32) -> (i32, i32, i32) {
    %c0_i32 = arith.constant 0 : i32
    %c0_i32_0 = arith.constant 0 : i32
    %c0_i32_1 = arith.constant 0 : i32
    return %arg0, %c0_i32, %c0_i32_0 : i32, i32, i32
  }
  func.func @transform_18(%arg0: i32) -> (i32, i32, i32) {
    %c0_i32 = arith.constant 0 : i32
    %c0_i32_0 = arith.constant 0 : i32
    %c0_i32_1 = arith.constant 0 : i32
    return %arg0, %c0_i32, %c0_i32_0 : i32, i32, i32
  }
  func.func @transform_19(%arg0: i32) -> (i32, i32, i32) {
    %c0_i32 = arith.constant 0 : i32
    %c0_i32_0 = arith.constant 0 : i32
    %c0_i32_1 = arith.constant 0 : i32
    return %arg0, %c0_i32, %c0_i32_0 : i32, i32, i32
  }
  func.func @transform_20(%arg0: i32) -> (i32, i32, i32) {
    %c0_i32 = arith.constant 0 : i32
    %c0_i32_0 = arith.constant 0 : i32
    %c0_i32_1 = arith.constant 0 : i32
    return %arg0, %c0_i32, %c0_i32_0 : i32, i32, i32
  }
  func.func @transform_21(%arg0: i32) -> (i32, i32, i32) {
    %c0_i32 = arith.constant 0 : i32
    %c0_i32_0 = arith.constant 0 : i32
    %c0_i32_1 = arith.constant 0 : i32
    return %arg0, %c0_i32, %c0_i32_0 : i32, i32, i32
  }
  func.func @transform_22(%arg0: i32) -> (i32, i32, i32) {
    %c0_i32 = arith.constant 0 : i32
    %c0_i32_0 = arith.constant 0 : i32
    %c0_i32_1 = arith.constant 0 : i32
    return %arg0, %c0_i32, %c0_i32_0 : i32, i32, i32
  }
}

</mosaic_0001>

<bundles_post_ra>
// kernel: ensemble_forward.3
= control target key start
LH: loop header
LB: loop body
LE: loop exit
PB: predicated region body
PF: predicated region fallthrough
CT: control target
= control target key end

     0   :  { %s102_s0 = inlined_call_operand.vmem [shape: f32[2,16,128], index: 0, kind: input, shape index: {}]   ;;  %s103_s1 = inlined_call_operand.hbm [shape: f32[16,128], index: 1, kind: output, shape index: {}]  }
   0x1   :  { %v9_v0 = vld [vmem:[%s102_s0] sm:$0xff]  ;;  %v36_v1 = vld [vmem:[%s102_s0 + $0x10] sm:$0xff]  ;;  %v10_v2 = vld [vmem:[%s102_s0 + $0x8] sm:$0xff] }
   0x2   :  { %v14_v3 = vadd.f32 %v36_v1, %v9_v0  ;;  %v37_v4 = vld [vmem:[%s102_s0 + $0x18] sm:$0xff] }
   0x3   :  { %6 = vsyncpa [#allocation3], 0  ;;  %s65_s14 = smov [#allocation2]   ;;  %v15_v5 = vadd.f32 %v37_v4, %v10_v2 }
   0x4   :  { %s25_s15 = sshll.u32 %s65_s14, 4  ;;  %v16_v6 = vmul.f32 0.5, %v14_v3  ;;  %s26_s15 = int_to_ptr.vmem [resolvable:$true] %s25_s15 }
   0x5   :  { %v17_v7 = vmul.f32 0.5, %v15_v5  ;;  %s41_s16 = scalar_lea.vmem %s26_s15, 256  ;;  %p46_p1 = scmp.lt.s32.totalorder %s26_s15, %s26_s15 }
   0x6   :  { %18 = vst [vmem:[#allocation2] sm:$0xff] %v16_v6  ;;  %p42_p0 = scmp.ne.s32.totalorder %s26_s15, %s41_s16  ;;  %p47_p2 = scmp.lt.s32.totalorder %s41_s16, %s41_s16 }
   0x7   :  { %19 = vst [vmem:[#allocation2 + $0x8] sm:$0xff] %v17_v7 }
   0x8   :  { %p48_p3 = por %p47_p2, %p46_p1 }
   0xa   :  { %p49_p4 = pnand %p48_p3, %p42_p0 }
   0xc   :  { %52 = shalt.err (!%p49_p4)
}
   0xd   :  { %s53_s0 = scalar_lea.hbm %s103_s1, 256 }
   0xe   :  { %p54_p5 = scmp.ne.s32.totalorder %s103_s1, %s53_s0  ;;  %p57_p6 = scmp.lt.u32.totalorder %s53_s0, %s103_s1 }
  0x10   :  { %p59_p7 = pnand %p57_p6, %p54_p5 }
  0x12   :  { %62 = shalt.err (!%p59_p7)
}
  0x13   :  { %s66_s23 = smov 128   ;;  %s67_s24 = smov 8  }
  0x14   :  { %31 = dma.vmem_to_hbm [thread:$0]  %s26_s15, 256, %s103_s1, [#allocation3], %s66_s23, %s66_s23, %s67_s24  }
  0x15   :  { %63 = dma.done.wait [#allocation3], 256  }
  0x16   :  { %64 = vsyncadd [#allocation3], 4294967040 }
  0x17   :  { %35 = vsyncpa [#allocation3], 1 }

// kernel: ensemble_forward.2
= control target key start
LH: loop header
LB: loop body
LE: loop exit
PB: predicated region body
PF: predicated region fallthrough
CT: control target
= control target key end

     0   :  { %s4760_s0 = inlined_call_operand.vmem [shape: f32[2,16,32], index: 0, kind: input, shape index: {}]   ;;  %s4761_s1 = inlined_call_operand.vmem [shape: f32[16,16], index: 1, kind: input, shape index: {}]   ;;  %s4762_s2 = inlined_call_operand.vmem [shape: f32[2,1,32], index: 2, kind: input, shape index: {}]   ;;  %s4763_s3 = inlined_call_operand.vmem [shape: f32[2,1,32], index: 3, kind: input, shape index: {}]   ;;  %s4764_s4 = inlined_call_operand.vmem [shape: f32[2,2,32,96], index: 4, kind: input, shape index: {}]   ;;  %s4765_s5 = inlined_call_operand.vmem [shape: f32[2,2,1,96], index: 5, kind: input, shape index: {}]   ;;  %s4766_s6 = inlined_call_operand.vmem [shape: f32[2,2,32,32], index: 6, kind: input, shape index: {}]   ;;  %s4767_s7 = inlined_call_operand.vmem [shape: f32[2,2,1,32], index: 7, kind: input, shape index: {}]   ;;  %s4768_s8 = inlined_call_operand.vmem [shape: f32[2,2,1,32], index: 8, kind: input, shape index: {}]   ;;  %s4769_s9 = inlined_call_operand.vmem [shape: f32[2,2,1,32], index: 9, kind: input, shape index: {}]   ;;  %s4770_s10 = inlined_call_operand.vmem [shape: f32[2,2,32,64], index: 10, kind: input, shape index: {}]   ;;  %s4771_s11 = inlined_call_operand.vmem [shape: f32[2,2,1,64], index: 11, kind: input, shape index: {}]   ;;  %s4772_s12 = inlined_call_operand.vmem [shape: f32[2,2,64,32], index: 12, kind: input, shape index: {}]   ;;  %s4773_s13 = inlined_call_operand.vmem [shape: f32[2,2,1,32], index: 13, kind: input, shape index: {}]   ;;  %s4774_s14 = inlined_call_operand.vmem [shape: f32[2,2,1,32], index: 14, kind: input, shape index: {}]   ;;  %s4775_s15 = inlined_call_operand.vmem [shape: f32[2,2,1,32], index: 15, kind: input, shape index: {}]   ;;  %s4776_s16 = inlined_call_operand.vmem [shape: f32[2,32,32], index: 16, kind: input, shape index: {}]   ;;  %s4777_s17 = inlined_call_operand.vmem [shape: f32[2,1,32], index: 17, kind: input, shape index: {}]   ;;  %s4778_s18 = inlined_call_operand.vmem [shape: f32[2,1,32], index: 18, kind: input, shape index: {}]   ;;  %s4779_s19 = inlined_call_operand.vmem [shape: f32[2,1,32], index: 19, kind: input, shape index: {}]   ;;  %s4780_s20 = inlined_call_operand.vmem [shape: f32[2,32,128], index: 20, kind: input, shape index: {}]   ;;  %s4781_s21 = inlined_call_operand.vmem [shape: f32[2,1,128], index: 21, kind: input, shape index: {}]   ;;  %s4782_s22 = inlined_call_operand.vmem [shape: f32[2,16,128], index: 22, kind: output, shape index: {}]  }
   0x1   :  { %4792 = sst [smem:[#allocation2_spill]] %s4760_s0 }
   0x2   :  { %4793 = sst [smem:[#allocation3_spill]] %s4761_s1 }
   0x3   :  { %4794 = sst [smem:[#allocation4_spill]] %s4762_s2 }
   0x4   :  { %4795 = sst [smem:[#allocation5_spill]] %s4763_s3  ;;  %s4407_s3 = smov 0  }
   0x5   :  { %4796 = sst [smem:[#allocation6_spill]] %s4764_s4 }
   0x6   :  { %4797 = sst [smem:[#allocation7_spill]] %s4765_s5 }
   0x7   :  { %4798 = sst [smem:[#allocation8_spill]] %s4766_s6 }
   0x8   :  { %4799 = sst [smem:[#allocation9_spill]] %s4767_s7 }
   0x9   :  { %4800 = sst [smem:[#allocation10_spill]] %s4768_s8 }
   0xa   :  { %4801 = sst [smem:[#allocation11_spill]] %s4769_s9 }
   0xb LB: > { %s3577_s28 = sadd.s32 4294967295, %s4285_s3   ;;  %p3581_p0 = scmp.ge.s32.totalorder %s4285_s3, 1  ;;  %s4285_s3 = sphi %s4407_s3, %s32_s3  }
   0xc   : > { %p792_p1 = scmp.lt.s32.totalorder %s4285_s3, 3 }
   0xe   : > { %p793_p2 = pnand %p3581_p0, %p792_p1 }
   0xf   : > { %p934_p3 = scmp.lt.s32.totalorder (!%p793_p2), %s3577_s28, 1  ;;  %vm1030_vm0 = vcmask (!%p793_p2), 261120   ;;  %s4802_s0 = sld [smem:[#allocation2_spill]] (!%p793_p2)  ;;  %vm1177_vm1 = vcmask (!%p793_p2), 130048   ;;  %vm1921_vm3 = vcmask (!%p793_p2), 523264  }
  0x10   : > { %796 = sbr.rel (%p793_p2) target bundleno = 6666 (0x1a0a), region = 108  ;;  %s4803_s6 = sld [smem:[#allocation6_spill]] (!%p793_p2)  ;;  %vm4477_vm2 = vmpackc.low (!%p793_p2), %vm1177_vm1, %vm1177_vm1 }
  0x11   : > { %s4804_s27 = sld [smem:[#allocation4_spill]] (!%p793_p2)  ;;  %s4806_s2 = sld [smem:[#allocation7_spill]] (!%p793_p2) }
  0x12   : > { %s4789_s4 = smov (!%p793_p2), 96   ;;  %s4811_s7 = sld [smem:[#allocation9_spill]] (!%p793_p2) }
  0x13   : > { %s4812_s8 = sld [smem:[#allocation10_spill]] (!%p793_p2)  ;;  %s4813_s9 = sld [smem:[#allocation11_spill]] (!%p793_p2) }
  0x17   : > { %s4821_s28 = smov (!%p934_p3, %s3577_s28), 1 }
  0x18   : > { %s4784_s29 = sshll.u32 %s4821_s28, 4  ;;  %s4428_s1 = sshll.u32 %s4821_s28, 6 }
  0x19   : > { %s938_s23 = scalar_lea.vmem %s4802_s0, %s4784_s29  ;;  %s4434_s25 = scalar_lea.vmem %s4803_s6, %s4428_s1 }
  0x1a   : > { %v1024_v0 = vld [vmem:[%s938_s23] sm:$0xff]  ;;  %v1025_v1 = vld [vmem:[%s938_s23 + $0x8] sm:$0xff]  ;;  %v1076_v16 = vld [vmem:[%s4434_s25 + $0x10] sm:$0xff]  ;;  %s941_s30 = scalar_lea.vmem %s4804_s27, %s4821_s28  ;;  %s4805_s23 = sld [smem:[#allocation5_spill]] }
  0x1b   : > { %v1031_v2 = vsel %vm1030_vm0, %v1024_v0, 0.0  ;;  %v1034_v3 = vsel %vm1030_vm0, %v1025_v1, 0.0  ;;  %v1074_v14 = vld [vmem:[%s4434_s25] sm:$0xff]  ;;  %v1075_v15 = vld [vmem:[%s4434_s25 + $0x8] sm:$0xff]  ;;  %v1077_v18 = vld [vmem:[%s4434_s25 + $0x18] sm:$0xff]  ;;  %s4457_s24 = sshll.u32 %s4821_s28, 1 }
  0x1c   : > { %1032 = vadd.xlane.f32.xlu0 %v1031_v2  ;;  %v4006_v17 = vpack.c.bf16 %v1075_v15, %v1074_v14  ;;  %v4010_v19 = vpack.c.bf16 %v1077_v18, %v1076_v16  ;;  %v3606_v27 = vld [vmem:[%s941_s30] ss:$0 sm:$0xff]  ;;  %s4463_s27 = scalar_lea.vmem %s4806_s2, %s4457_s24  ;;  %s4790_s30 = smov 80  }
  0x1d   : > { %v3608_v36 = vld [vmem:[%s4463_s27] ss:$0 sm:$0xff]  ;;  %s4785_s0 = smov 112   ;;  %s4809_s6 = sld [smem:[#allocation3_spill]] }
  0x1e   : > { %4007 = vmatprep.subr.bf16.mxu0 %v4006_v17  ;;  %s4810_s29 = sld [smem:[#allocation8_spill]]  ;;  %s4540_s2 = scalar_lea.vmem %s4811_s7, %s4457_s24 }
  0x1f   : > { %4009 = vmatpush3.bf16.msra.mxu0 %v4006_v17  ;;  %s4563_s26 = scalar_lea.vmem %s4812_s8, %s4457_s24  ;;  %s4617_s7 = scalar_lea.vmem %s4774_s14, %s4457_s24 }
  0x20   : > { %1035 = vadd.xlane.f32.xlu0 %v1034_v3  ;;  %4011 = vmatprep.subr.bf16.mxu0 %v4010_v19  ;;  %s944_s5 = scalar_lea.vmem %s4805_s23, %s4821_s28  ;;  %s4788_s23 = smov 64  }
  0x21   : > { %v3607_v29 = vld [vmem:[%s944_s5] ss:$0 sm:$0xff]  ;;  %s4787_s5 = smov 48   ;;  %s4814_s8 = smov 80  }
  0x23   : > { %4013 = vmatpush3.bf16.msra.mxu0 %v4010_v19  ;;  %v4495_v54 = vld [vmem:[%s4809_s6 + $0x8] sm:$0xff]  ;;  %v4500_v58 = vld [vmem:[%s4809_s6] sm:$0xff]  ;;  %s4602_s6 = scalar_lea.vmem %s4773_s13, %s4457_s24 }
  0xa9   : > { %v1033_v4 = vpop.xlane.xlu0 %1032 }
  0xaa   : > { %v1038_v5 = vmul.f32 0.03125, %v1033_v4 }
  0xac   : > { %v1040_v6 = vsub.f32 %v1024_v0, %v1038_v5 }
  0xad   : > { %v1036_v7 = vpop.xlane.xlu0 %1035 }
  0xae   : > { %v1039_v8 = vmul.f32 0.03125, %v1036_v7  ;;  %v1042_v9 = vmul.f32 %v1040_v6, %v1040_v6 }
  0xb0   : > { %v1041_v10 = vsub.f32 %v1025_v1, %v1039_v8  ;;  %v1044_v11 = vsel %vm1030_vm0, %v1042_v9, 0.0 }
  0xb1   : > { %1045 = vadd.xlane.f32.xlu1 %v1044_v11 }
  0xb2   : > { %v1043_v12 = vmul.f32 %v1041_v10, %v1041_v10 }
  0xb4   : > { %v1047_v13 = vsel %vm1030_vm0, %v1043_v12, 0.0 }
  0xb5   : > { %1048 = vadd.xlane.f32.xlu1 %v1047_v13 }
 0x13e   : > { %v1046_v20 = vpop.xlane.xlu1 %1045 }
 0x13f   : > { %v1050_v21 = vmul.f32 0.03125, %v1046_v20 }
 0x141   : > { %v1052_v22 = vadd.f32 1e-12, %v1050_v21 }
 0x142   : > { %v1049_v23 = vpop.xlane.xlu1 %1048 }
 0x143   : > { %4203 = vrsqrt.f32 %v1052_v22  ;;  %v1051_v24 = vmul.f32 0.03125, %v1049_v23 }
 0x145   : > { %v1053_v25 = vadd.f32 1e-12, %v1051_v24 }
 0x147   : > { %4205 = vrsqrt.f32 %v1053_v25 }
 0x14d   : > { %v4204_v26 = vpop.eup %4203 }
 0x14e   : > { %v1056_v28 = vmul.f32 %v4204_v26, %v1040_v6 }
 0x150   : > { %v1064_v30 = vmul.f32 %v3606_v27, %v1056_v28 }
 0x151   : > { %v4206_v31 = vpop.eup %4205 }
 0x152   : > { %v1057_v32 = vmul.f32 %v4206_v31, %v1041_v10  ;;  %v4448_v33 = vadd.f32 %v3607_v29, %v1064_v30 }
 0x154   : > { %v1065_v34 = vmul.f32 %v3606_v27, %v1057_v32  ;;  %3826 = vmatprep.mubr.msk.f32.mxu0 %vm1030_vm0, %v4448_v33 }
 0x156   : > { %v4452_v35 = vadd.f32 %v3607_v29, %v1065_v34 }
 0x158   : > { %3827 = vmatmul.mubr.msk.f32.vlgmr.msra.gmra.mrb[0].mxu0 %vm1030_vm0, %v4452_v35 }
 0x22b   : > { %v3828_v37 = vpop.f32.mrb[0].mxu0 }
 0x22c   : > { %v1163_v38 = vadd.f32 %v3828_v37, %v3608_v36  ;;  %v1157_v39 = vpop.f32.mrb[1].mxu0 }
 0x22d   : > { %v1158_v40 = vadd.f32 %v3608_v36, %v1157_v39 }
 0x22f   : > { %3833 = vmatprep.mubr.msk.f32.mxu1 %vm1177_vm1, %v1158_v40  ;;  %v4467_v41 = vpack.i.bf16 %v1163_v38, %v1158_v40 }
 0x231   : > { %4169 = vrot.lane.b32.xlu1 %v4467_v41, %s4790_s30  ;;  %4164 = vrot.lane.b32.xlu0 %v4467_v41, %s4789_s4  ;;  %s4569_s30 = scalar_lea.vmem %s4813_s9, %s4457_s24  ;;  %s4815_s9 = smov 96  }
 0x235   : > { %1463 = vrot.lane.b32.xlu1 %v1158_v40, %s4785_s0 }
 0x239   : > { %1465 = vrot.lane.b32.xlu1 %v1163_v38, %s4785_s0  ;;  %s4522_s0 = scalar_lea.vmem %s4810_s29, %s4428_s1 }
 0x23a   : > { %v1166_v31 = vld [vmem:[%s4522_s0] sm:$0xff]  ;;  %v1167_v32 = vld [vmem:[%s4522_s0 + $0x8] sm:$0xff] }
 0x2a3   : > { %v4170_v42 = vpop.permute.xlu1 %4169  ;;  %v4165_v43 = vpop.permute.xlu0 %4164 }
 0x2a4   : > { %v4172_v44 = vunpack.i.h.bf16 %v4170_v42  ;;  %v4171_v45 = vunpack.i.l.bf16 %v4170_v42  ;;  %v4167_v46 = vunpack.i.h.bf16 %v4165_v43  ;;  %v4166_v47 = vunpack.i.l.bf16 %v4165_v43 }
 0x2a6   : > { %v4028_v49 = vpack.c.bf16 %v4172_v44, %v4171_v45  ;;  %v4014_v50 = vpack.c.bf16 %v4167_v46, %v4166_v47 }
 0x2a7   : > { %v1464_v51 = vpop.permute.xlu1 %1463 }
 0x2a8   : > { %4016 = vmatprep.subr.msk.bf16.mxu1 %vm4477_vm2, %v4014_v50  ;;  %4030 = vmatprep.subr.msk.bf16.mxu0 %vm4477_vm2, %v4028_v49 }
 0x2a9   : > { %3854 = vmatprep.mubr.msk.f32.mxu0 %vm1177_vm1, %v1464_v51  ;;  %4019 = vmatpush3.bf16.xpose.msk.msra.mxu1 %vm4477_vm2, %v4014_v50  ;;  %v1169_v50 = vld [vmem:[%s4522_s0 + $0x18] sm:$0xff] }
 0x2aa   : > { %4033 = vmatpush3.bf16.xpose.msk.msra.mxu0 %vm4477_vm2, %v4028_v49  ;;  %v1168_v49 = vld [vmem:[%s4522_s0 + $0x10] sm:$0xff] }
 0x2ab   : > { %v1466_v52 = vpop.permute.xlu1 %1465 }
 0x2b0   : > { %3834 = vmatmul.mubr.msk.f32.vlgmr.msra.gmra.mrb[0].mxu1 %vm1177_vm1, %v1163_v38  ;;  %v4024_v38 = vpack.c.bf16 %v1167_v32, %v1166_v31 }
 0x2b1   : > { %3855 = vmatmul.mubr.msk.f32.vlgmr.msra.gmra.mrb[2].mxu0 %vm1177_vm1, %v1466_v52 }
 0x383   : > { %v3835_v53 = vpop.f32.mrb[0].mxu1 }
 0x384   : > { %v1262_v55 = vmul.f32 0.25, %v3835_v53  ;;  %v3856_v56 = vpop.f32.mrb[2].mxu0  ;;  %v1252_v57 = vpop.f32.mrb[1].mxu1 }
 0x385   : > { %v1261_v59 = vmul.f32 0.25, %v1252_v57  ;;  %v1545_v60 = vpop.f32.mrb[3].mxu0  ;;  %v1555_v0 = vmul.f32 0.25, %v3856_v56 }
 0x386   : > { %v1554_v61 = vmul.f32 0.25, %v1545_v60  ;;  %v1264_v62 = vadd.f32 %v1262_v55, %v4495_v54  ;;  %v4038_v55 = vpack.c.bf16 %v1169_v50, %v1168_v49 }
 0x387   : > { %v1263_v63 = vadd.f32 %v1261_v59, %v4500_v58  ;;  %v1557_v5 = vadd.f32 %v1555_v0, %v4495_v54 }
 0x388   : > { %v1268_v1 = vsel %vm1177_vm1, %v1264_v62, -inf  ;;  %v1556_v2 = vadd.f32 %v1554_v61, %v4500_v58 }
 0x389   : > { %1269 = vmax.xlane.f32.xlu1 %v1268_v1  ;;  %v1265_v3 = vsel %vm1177_vm1, %v1263_v63, -inf  ;;  %v1561_v6 = vsel %vm1177_vm1, %v1557_v5, -inf }
 0x38a   : > { %1266 = vmax.xlane.f32.xlu0 %v1265_v3  ;;  %v1558_v4 = vsel %vm1177_vm1, %v1556_v2, -inf }
 0x38d   : > { %1559 = vmax.xlane.f32.xlu1 %v1558_v4 }
 0x391   : > { %1562 = vmax.xlane.f32.xlu1 %v1561_v6 }
 0x416   : > { %v1270_v7 = vpop.xlane.xlu1 %1269 }
 0x417   : > { %v1272_v8 = vsub.f32 %v1264_v62, %v1270_v7  ;;  %v1267_v9 = vpop.xlane.xlu0 %1266  ;;  %v3619_v62 = vld [vmem:[%s4540_s2] ss:$0 sm:$0xff] }
 0x418   : > { %v1271_v10 = vsub.f32 %v1263_v63, %v1267_v9 }
 0x419   : > { %v1275_v11 = vmul.f32 1.442695, %v1272_v8 }
 0x41a   : > { %v1273_v12 = vmul.f32 1.442695, %v1271_v10  ;;  %v1560_v13 = vpop.xlane.xlu1 %1559 }
 0x41b   : > { %4207 = vpow2.f32 %v1275_v11  ;;  %v1564_v14 = vsub.f32 %v1556_v2, %v1560_v13 }
 0x41c   : > { %4209 = vpow2.f32 %v1273_v12 }
 0x41d   : > { %v1566_v17 = vmul.f32 1.442695, %v1564_v14 }
 0x41e   : > { %v1563_v15 = vpop.xlane.xlu1 %1562 }
 0x41f   : > { %v1565_v16 = vsub.f32 %v1557_v5, %v1563_v15 }
 0x421   : > { %v1568_v18 = vmul.f32 1.442695, %v1565_v16 }
 0x423   : > { %4211 = vpow2.f32 %v1568_v18 }
 0x424   : > { %4213 = vpow2.f32 %v1566_v17 }
 0x425   : > { %v4208_v19 = vpop.eup %4207 }
 0x426   : > { %v1280_v20 = vsel %vm1177_vm1, %v4208_v19, 0.0  ;;  %v4210_v21 = vpop.eup %4209 }
 0x427   : > { %1281 = vadd.xlane.f32.xlu0 %v1280_v20  ;;  %v1277_v22 = vsel %vm1177_vm1, %v4210_v21, 0.0 }
 0x42b   : > { %1278 = vadd.xlane.f32.xlu0 %v1277_v22 }
 0x42d   : > { %v4212_v23 = vpop.eup %4211 }
 0x42e   : > { %v1573_v24 = vsel %vm1177_vm1, %v4212_v23, 0.0  ;;  %v4214_v25 = vpop.eup %4213 }
 0x42f   : > { %1574 = vadd.xlane.f32.xlu1 %v1573_v24  ;;  %v1570_v26 = vsel %vm1177_vm1, %v4214_v25, 0.0 }
 0x433   : > { %1571 = vadd.xlane.f32.xlu1 %v1570_v26 }
 0x441   : > { %4174 = vrot.lane.b32.xlu0 %v4467_v41, %s4788_s23  ;;  %s4593_s23 = scalar_lea.vmem %s4771_s11, %s4457_s24 }
 0x444   : > { %4179 = vrot.lane.b32.xlu1 %v4467_v41, %s4787_s5  ;;  %s4553_s5 = scalar_lea.vmem %s4770_s10, %s4428_s1  ;;  %s3710_s1 = sshll.u32 %s4821_s28, 7 }
 0x445   : > { %v1797_v16 = vld [vmem:[%s4553_s5 + $0x8] sm:$0xff]  ;;  %v1798_v18 = vld [vmem:[%s4553_s5 + $0x10] sm:$0xff]  ;;  %s4579_s29 = scalar_lea.vmem %s4772_s12, %s3710_s1  ;;  %s4818_s1 = smov 48  }
 0x446   : > { %v1912_v49 = vld [vmem:[%s4579_s29 + $0x30] sm:$0xff]  ;;  %v1913_v50 = vld [vmem:[%s4579_s29 + $0x38] sm:$0xff] }
 0x4b4   : > { %v1282_v27 = vpop.xlane.xlu0 %1281 }
 0x4b5   : > { %4215 = vrcp.f32 %v1282_v27 }
 0x4b8   : > { %v1279_v28 = vpop.xlane.xlu0 %1278 }
 0x4b9   : > { %4217 = vrcp.f32 %v1279_v28  ;;  %v3628_v28 = vld [vmem:[%s4563_s26] ss:$0 sm:$0xff] }
 0x4bc   : > { %v1575_v29 = vpop.xlane.xlu1 %1574  ;;  %v4175_v30 = vpop.permute.xlu0 %4174 }
 0x4bd   : > { %v4177_v34 = vunpack.i.h.bf16 %v4175_v30  ;;  %v4176_v36 = vunpack.i.l.bf16 %v4175_v30  ;;  %v3629_v30 = vld [vmem:[%s4569_s30] ss:$0 sm:$0xff] }
 0x4bf   : > { %v4020_v37 = vpack.c.bf16 %v4177_v34, %v4176_v36  ;;  %v4216_v40 = vpop.eup %4215 }
 0x4c0   : > { %v1572_v39 = vpop.xlane.xlu1 %1571  ;;  %v1286_v44 = vmul.f32 %v4216_v40, %v4208_v19  ;;  %v1799_v19 = vld [vmem:[%s4553_s5 + $0x18] sm:$0xff]  ;;  %v1907_v40 = vld [vmem:[%s4579_s29 + $0x8] sm:$0xff] }
 0x4c1   : > { %4021 = vmatprep.subr.bf16.mxu1 %v4020_v37  ;;  %4219 = vrcp.f32 %v1572_v39  ;;  %v4046_v20 = vpack.c.bf16 %v1799_v19, %v1798_v18  ;;  %v1906_v39 = vld [vmem:[%s4579_s29] sm:$0xff] }
 0x4c2   : > { %4023 = vmatpush3.bf16.msra.mxu1 %v4020_v37  ;;  %4221 = vrcp.f32 %v1575_v29 }
 0x4c3   : > { %v4218_v41 = vpop.eup %4217  ;;  %4025 = vmatprep.subr.bf16.mxu1 %v4024_v38 }
 0x4c4   : > { %v4180_v42 = vpop.permute.xlu1 %4179  ;;  %v1285_v43 = vmul.f32 %v4218_v41, %v4210_v21  ;;  %v4050_v41 = vpack.c.bf16 %v1907_v40, %v1906_v39 }
 0x4c5   : > { %v4182_v45 = vunpack.i.h.bf16 %v4180_v42  ;;  %v4181_v46 = vunpack.i.l.bf16 %v4180_v42  ;;  %v1908_v42 = vld [vmem:[%s4579_s29 + $0x10] sm:$0xff] }
 0x4c6   : > { %3840 = vmatprep.mubr.msk.f32.mxu1 %vm1177_vm1, %v1285_v43  ;;  %v1909_v43 = vld [vmem:[%s4579_s29 + $0x18] sm:$0xff] }
 0x4c7   : > { %v4034_v47 = vpack.c.bf16 %v4182_v45, %v4181_v46  ;;  %3841 = vmatmul.mubr.msk.f32.vlgmr.msra.gmra.mrb[2].mxu1 %vm1177_vm1, %v1286_v44  ;;  %v4054_v44 = vpack.c.bf16 %v1909_v43, %v1908_v42  ;;  %v1910_v45 = vld [vmem:[%s4579_s29 + $0x20] sm:$0xff]  ;;  %v1911_v46 = vld [vmem:[%s4579_s29 + $0x28] sm:$0xff] }
 0x4c8   : > { %4027 = vmatpush3.bf16.msra.mxu1 %v4024_v38 }
 0x4c9   : > { %4035 = vmatprep.subr.bf16.mxu1 %v4034_v47 }
 0x4cb   : > { %v4220_v51 = vpop.eup %4219 }
 0x4cc   : > { %v4222_v56 = vpop.eup %4221  ;;  %v1578_v57 = vmul.f32 %v4220_v51, %v4214_v25  ;;  %v4062_v51 = vpack.c.bf16 %v1913_v50, %v1912_v49 }
 0x4cd   : > { %v1579_v59 = vmul.f32 %v4222_v56, %v4212_v23 }
 0x59a   : > { %v3842_v52 = vpop.f32.mrb[2].mxu1 }
 0x59b   : > { %v1365_v53 = vpop.f32.mrb[3].mxu1 }
 0x59c   : > { %3847 = vmatprep.mubr.msk.f32.mxu1 %vm1177_vm1, %v1365_v53 }
 0x59d   : > { %3848 = vmatmul.mubr.msk.f32.vlgmr.msra.gmra.mrb[4].mxu1 %vm1177_vm1, %v3842_v52  ;;  %v3630_v52 = vld [vmem:[%s4593_s23] ss:$0 sm:$0xff] }
 0x59e   : > { %4037 = vmatpush3.bf16.msra.mxu1 %v4034_v47  ;;  %3861 = vmatprep.mubr.msk.f32.mxu1 %vm1177_vm1, %v1578_v57  ;;  %v4058_v47 = vpack.c.bf16 %v1911_v46, %v1910_v45  ;;  %v3636_v45 = vld [vmem:[%s4617_s7] ss:$0 sm:$0xff] }
 0x59f   : > { %4039 = vmatprep.subr.bf16.mxu1 %v4038_v55 }
 0x5a1   : > { %3862 = vmatmul.mubr.msk.f32.vlgmr.msra.gmra.mrb[6].mxu1 %vm1177_vm1, %v1579_v59 }
 0x5a2   : > { %4041 = vmatpush3.bf16.msra.mxu1 %v4038_v55 }
 0x5a3   : > { %4051 = vmatprep.subr.bf16.mxu1 %v4050_v41 }
 0x674   : > { %v3863_v60 = vpop.f32.mrb[6].mxu1 }
 0x675   : > { %v1658_v61 = vpop.f32.mrb[7].mxu1 }
 0x676   : > { %3868 = vmatprep.mubr.msk.f32.mxu1 %vm1177_vm1, %v1658_v61 }
 0x677   : > { %3869 = vmatmul.mubr.msk.f32.vlgmr.msra.gmra.mrb[4].mxu1 %vm1177_vm1, %v3863_v60 }
 0x678   : > { %4053 = vmatpush3.bf16.msra.mxu1 %v4050_v41 }
 0x679   : > { %4055 = vmatprep.subr.bf16.mxu1 %v4054_v44 }
 0x67c   : > { %4057 = vmatpush3.bf16.msra.mxu1 %v4054_v44 }
 0x67d   : > { %4059 = vmatprep.subr.bf16.mxu1 %v4058_v47 }
 0x680   : > { %4061 = vmatpush3.bf16.msra.mxu1 %v4058_v47 }
 0x681   : > { %4063 = vmatprep.subr.bf16.mxu1 %v4062_v51 }
 0x684   : > { %4065 = vmatpush3.bf16.msra.mxu1 %v4062_v51 }
 0x74a   : > { %v3870_v63 = vpop.f32.mrb[4].mxu1 }
 0x74b   : > { %v4142_v0 = vadd.f32 %v3870_v63, %v3619_v62  ;;  %v1739_v1 = vpop.f32.mrb[5].mxu1 }
 0x74c   : > { %v4143_v2 = vadd.f32 %v3619_v62, %v1739_v1 }
 0x74d   : > { %v1751_v3 = vadd.f32 %v4142_v0, %v4452_v35  ;;  %v1796_v35 = vld [vmem:[%s4553_s5] sm:$0xff] }
 0x74e   : > { %v1750_v4 = vadd.f32 %v4143_v2, %v4448_v33  ;;  %v4042_v17 = vpack.c.bf16 %v1797_v16, %v1796_v35 }
 0x74f   : > { %v1757_v5 = vsel %vm1030_vm0, %v1751_v3, 0.0 }
 0x750   : > { %1758 = vadd.xlane.f32.xlu1 %v1757_v5  ;;  %v1754_v6 = vsel %vm1030_vm0, %v1750_v4, 0.0  ;;  %4043 = vmatprep.subr.bf16.mxu0 %v4042_v17 }
 0x751   : > { %1755 = vadd.xlane.f32.xlu0 %v1754_v6  ;;  %4045 = vmatpush3.bf16.msra.mxu0 %v4042_v17 }
 0x752   : > { %4047 = vmatprep.subr.bf16.mxu0 %v4046_v20 }
 0x755   : > { %4049 = vmatpush3.bf16.msra.mxu0 %v4046_v20 }
 0x7dd   : > { %v1759_v7 = vpop.xlane.xlu1 %1758 }
 0x7de   : > { %v1761_v8 = vmul.f32 0.03125, %v1759_v7  ;;  %v1756_v9 = vpop.xlane.xlu0 %1755 }
 0x7df   : > { %v1760_v10 = vmul.f32 0.03125, %v1756_v9 }
 0x7e0   : > { %v1763_v11 = vsub.f32 %v1751_v3, %v1761_v8 }
 0x7e1   : > { %v1762_v12 = vsub.f32 %v1750_v4, %v1760_v10 }
 0x7e2   : > { %v1765_v15 = vmul.f32 %v1763_v11, %v1763_v11 }
 0x7e3   : > { %v1764_v13 = vmul.f32 %v1762_v12, %v1762_v12 }
 0x7e4   : > { %v1769_v33 = vsel %vm1030_vm0, %v1765_v15, 0.0 }
 0x7e5   : > { %v1766_v14 = vsel %vm1030_vm0, %v1764_v13, 0.0  ;;  %v3633_v13 = vld [vmem:[%s4602_s6] ss:$0 sm:$0xff] }
 0x7e6   : > { %1767 = vadd.xlane.f32.xlu0 %v1766_v14 }
 0x7ea   : > { %1770 = vadd.xlane.f32.xlu0 %v1769_v33 }
 0x873   : > { %v1768_v21 = vpop.xlane.xlu0 %1767 }
 0x874   : > { %v1772_v22 = vmul.f32 0.03125, %v1768_v21 }
 0x876   : > { %v1774_v23 = vadd.f32 1e-12, %v1772_v22 }
 0x877   : > { %v1771_v24 = vpop.xlane.xlu0 %1770 }
 0x878   : > { %4223 = vrsqrt.f32 %v1774_v23  ;;  %v1773_v25 = vmul.f32 0.03125, %v1771_v24 }
 0x87a   : > { %v1775_v26 = vadd.f32 1e-12, %v1773_v25 }
 0x87c   : > { %4225 = vrsqrt.f32 %v1775_v26 }
 0x882   : > { %v4224_v27 = vpop.eup %4223 }
 0x883   : > { %v1778_v29 = vmul.f32 %v4224_v27, %v1762_v12 }
 0x885   : > { %v1786_v31 = vmul.f32 %v3628_v28, %v1778_v29 }
 0x886   : > { %v4226_v32 = vpop.eup %4225 }
 0x887   : > { %v1779_v34 = vmul.f32 %v4226_v32, %v1763_v11  ;;  %v1794_v36 = vadd.f32 %v3629_v30, %v1786_v31  ;;  %v3639_v31 = vld [vmem:[%s4434_s25 + $0x28] sm:$0xff] }
 0x889   : > { %v1787_v37 = vmul.f32 %v3628_v28, %v1779_v34  ;;  %3879 = vmatprep.mubr.msk.f32.mxu0 %vm1030_vm0, %v1794_v36  ;;  %v3640_v34 = vld [vmem:[%s4434_s25 + $0x30] sm:$0xff] }
 0x88b   : > { %v1795_v38 = vadd.f32 %v3629_v30, %v1787_v37  ;;  %v3638_v30 = vld [vmem:[%s4434_s25 + $0x20] sm:$0xff] }
 0x88c   : > { %v4066_v32 = vpack.c.bf16 %v3639_v31, %v3638_v30 }
 0x88d   : > { %3880 = vmatmul.mubr.msk.f32.vlgmr.msra.gmra.mrb[4].mxu0 %vm1030_vm0, %v1795_v38 }
 0x88e   : > { %4067 = vmatprep.subr.bf16.mxu0 %v4066_v32 }
 0x88f   : > { %4069 = vmatpush3.bf16.msra.mxu0 %v4066_v32 }
 0x960   : > { %v3881_v53 = vpop.f32.mrb[4].mxu0 }
 0x961   : > { %v1885_v55 = vadd.f32 %v3881_v53, %v3630_v52  ;;  %v1879_v56 = vpop.f32.mrb[5].mxu0 }
 0x962   : > { %v1880_v57 = vadd.f32 %v3630_v52, %v1879_v56  ;;  %v3643_v56 = vld [vmem:[%s4463_s27 + $0x1] ss:$0 sm:$0xff]  ;;  %s4817_s27 = smov 64  }
 0x963   : > { %v1891_v59 = vmul.f32 0.044715, %v1885_v55  ;;  %v1889_v10 = vmul.f32 0.5, %v1885_v55 }
 0x964   : > { %v1890_v60 = vmul.f32 0.044715, %v1880_v57  ;;  %v1888_v8 = vmul.f32 0.5, %v1880_v57 }
 0x965   : > { %v1893_v61 = vmul.f32 %v1891_v59, %v1885_v55 }
 0x966   : > { %v1892_v62 = vmul.f32 %v1890_v60, %v1880_v57 }
 0x967   : > { %v1895_v63 = vmul.f32 %v1893_v61, %v1885_v55 }
 0x968   : > { %v1894_v0 = vmul.f32 %v1892_v62, %v1880_v57 }
 0x969   : > { %v1897_v1 = vadd.f32 %v1895_v63, %v1885_v55 }
 0x96a   : > { %v1896_v2 = vadd.f32 %v1894_v0, %v1880_v57 }
 0x96b   : > { %v1899_v3 = vmul.f32 0.7978846, %v1897_v1 }
 0x96c   : > { %v1898_v4 = vmul.f32 0.7978846, %v1896_v2 }
 0x96d   : > { %4227 = vtanh.f32 %v1899_v3 }
 0x96e   : > { %4229 = vtanh.f32 %v1898_v4 }
 0x977   : > { %v4228_v5 = vpop.eup %4227 }
 0x978   : > { %v4230_v6 = vpop.eup %4229  ;;  %v1903_v7 = vadd.f32 1.0, %v4228_v5 }
 0x979   : > { %v1902_v9 = vadd.f32 1.0, %v4230_v6 }
 0x97a   : > { %v1905_v12 = vmul.f32 %v1903_v7, %v1889_v10 }
 0x97b   : > { %v1904_v11 = vmul.f32 %v1902_v9, %v1888_v8 }
 0x97d   : > { %3898 = vmatprep.mubr.msk.f32.mxu1 %vm1921_vm3, %v1904_v11 }
 0x97e   : > { %3899 = vmatmul.mubr.msk.f32.vlgmr.msra.gmra.mrb[8].mxu1 %vm1921_vm3, %v1905_v12 }
 0xa51   : > { %v3900_v14 = vpop.f32.mrb[8].mxu1 }
 0xa52   : > { %v1994_v15 = vpop.f32.mrb[9].mxu1  ;;  %v2000_v33 = vadd.f32 %v3900_v14, %v3633_v13 }
 0xa53   : > { %v1995_v35 = vadd.f32 %v3633_v13, %v1994_v15 }
 0xa54   : > { %v2004_v18 = vadd.f32 %v2000_v33, %v1795_v38 }
 0xa55   : > { %v2003_v16 = vadd.f32 %v1995_v35, %v1794_v36  ;;  %v3641_v36 = vld [vmem:[%s4434_s25 + $0x38] sm:$0xff]  ;;  %s4623_s25 = scalar_lea.vmem %s4775_s15, %s4457_s24  ;;  %s4816_s24 = smov 112  }
 0xa56   : > { %v2010_v19 = vsel %vm1030_vm0, %v2004_v18, 0.0  ;;  %v4070_v37 = vpack.c.bf16 %v3641_v36, %v3640_v34  ;;  %v3637_v47 = vld [vmem:[%s4623_s25] ss:$0 sm:$0xff] }
 0xa57   : > { %v2007_v17 = vsel %vm1030_vm0, %v2003_v16, 0.0 }
 0xa58   : > { %2008 = vadd.xlane.f32.xlu0 %v2007_v17  ;;  %4071 = vmatprep.subr.bf16.mxu0 %v4070_v37 }
 0xa59   : > { %4073 = vmatpush3.bf16.msra.mxu0 %v4070_v37 }
 0xa5c   : > { %2011 = vadd.xlane.f32.xlu0 %v2010_v19 }
 0xae5   : > { %v2009_v20 = vpop.xlane.xlu0 %2008 }
 0xae6   : > { %v2013_v21 = vmul.f32 0.03125, %v2009_v20 }
 0xae8   : > { %v2015_v22 = vsub.f32 %v2003_v16, %v2013_v21 }
 0xae9   : > { %v2012_v23 = vpop.xlane.xlu0 %2011 }
 0xaea   : > { %v2014_v24 = vmul.f32 0.03125, %v2012_v23  ;;  %v2017_v25 = vmul.f32 %v2015_v22, %v2015_v22 }
 0xaec   : > { %v2016_v26 = vsub.f32 %v2004_v18, %v2014_v24  ;;  %v2019_v27 = vsel %vm1030_vm0, %v2017_v25, 0.0 }
 0xaed   : > { %2020 = vadd.xlane.f32.xlu0 %v2019_v27 }
 0xaee   : > { %v2018_v28 = vmul.f32 %v2016_v26, %v2016_v26 }
 0xaf0   : > { %v2022_v29 = vsel %vm1030_vm0, %v2018_v28, 0.0 }
 0xaf1   : > { %2023 = vadd.xlane.f32.xlu1 %v2022_v29 }
 0xb7a   : > { %v2021_v38 = vpop.xlane.xlu0 %2020 }
 0xb7b   : > { %v2025_v39 = vmul.f32 0.03125, %v2021_v38 }
 0xb7d   : > { %v2027_v40 = vadd.f32 1e-12, %v2025_v39 }
 0xb7e   : > { %v2024_v41 = vpop.xlane.xlu1 %2023 }
 0xb7f   : > { %4231 = vrsqrt.f32 %v2027_v40  ;;  %v2026_v42 = vmul.f32 0.03125, %v2024_v41 }
 0xb81   : > { %v2028_v43 = vadd.f32 1e-12, %v2026_v42 }
 0xb83   : > { %4233 = vrsqrt.f32 %v2028_v43 }
 0xb89   : > { %v4232_v44 = vpop.eup %4231 }
 0xb8a   : > { %v2031_v46 = vmul.f32 %v4232_v44, %v2015_v22 }
 0xb8c   : > { %v2039_v49 = vmul.f32 %v3636_v45, %v2031_v46  ;;  %v3647_v46 = vld [vmem:[%s4522_s0 + $0x28] sm:$0xff] }
 0xb8d   : > { %v4234_v50 = vpop.eup %4233 }
 0xb8e   : > { %v2032_v51 = vmul.f32 %v4234_v50, %v2016_v26  ;;  %v4627_v52 = vadd.f32 %v3637_v47, %v2039_v49 }
 0xb90   : > { %v2040_v53 = vmul.f32 %v3636_v45, %v2032_v51  ;;  %3909 = vmatprep.mubr.msk.f32.mxu0 %vm1030_vm0, %v4627_v52  ;;  %v3646_v45 = vld [vmem:[%s4522_s0 + $0x20] sm:$0xff] }
 0xb91   : > { %v4084_v51 = vpack.c.bf16 %v3647_v46, %v3646_v45 }
 0xb92   : > { %v4631_v55 = vadd.f32 %v3637_v47, %v2040_v53 }
 0xb94   : > { %3910 = vmatmul.mubr.msk.f32.vlgmr.msra.gmra.mrb[6].mxu0 %vm1030_vm0, %v4631_v55 }
 0xc67   : > { %v3911_v57 = vpop.f32.mrb[6].mxu0 }
 0xc68   : > { %v2140_v59 = vadd.f32 %v3911_v57, %v3643_v56  ;;  %v2134_v60 = vpop.f32.mrb[7].mxu0 }
 0xc69   : > { %v2135_v61 = vadd.f32 %v3643_v56, %v2134_v60 }
 0xc6b   : > { %3916 = vmatprep.mubr.msk.f32.mxu0 %vm1177_vm1, %v2135_v61  ;;  %v4637_v62 = vpack.i.bf16 %v2140_v59, %v2135_v61 }
 0xc6d   : > { %4189 = vrot.lane.b32.xlu1 %v4637_v62, %s4814_s8  ;;  %4184 = vrot.lane.b32.xlu0 %v4637_v62, %s4815_s9  ;;  %s1007_s9 = scalar_lea.vmem %s4778_s18, %s4821_s28 }
 0xc71   : > { %2441 = vrot.lane.b32.xlu1 %v2135_v61, %s4816_s24 }
 0xc75   : > { %2443 = vrot.lane.b32.xlu1 %v2140_v59, %s4816_s24 }
 0xcdf   : > { %v4190_v63 = vpop.permute.xlu1 %4189  ;;  %v4185_v0 = vpop.permute.xlu0 %4184 }
 0xce0   : > { %v4192_v1 = vunpack.i.h.bf16 %v4190_v63  ;;  %v4191_v2 = vunpack.i.l.bf16 %v4190_v63  ;;  %v4187_v3 = vunpack.i.h.bf16 %v4185_v0  ;;  %v4186_v4 = vunpack.i.l.bf16 %v4185_v0 }
 0xce2   : > { %v4074_v5 = vpack.c.bf16 %v4187_v3, %v4186_v4  ;;  %v4088_v6 = vpack.c.bf16 %v4192_v1, %v4191_v2  ;;  %v3648_v2 = vld [vmem:[%s4522_s0 + $0x30] sm:$0xff]  ;;  %v3649_v3 = vld [vmem:[%s4522_s0 + $0x38] sm:$0xff] }
 0xce3   : > { %v2442_v7 = vpop.permute.xlu1 %2441 }
 0xce4   : > { %4076 = vmatprep.subr.msk.bf16.mxu0 %vm4477_vm2, %v4074_v5 }
 0xce5   : > { %4079 = vmatpush3.bf16.xpose.msk.msra.mxu0 %vm4477_vm2, %v4074_v5 }
 0xce6   : > { %4090 = vmatprep.subr.msk.bf16.mxu0 %vm4477_vm2, %v4088_v6 }
 0xce7   : > { %v2444_v8 = vpop.permute.xlu1 %2443 }
 0xcec   : > { %3917 = vmatmul.mubr.msk.f32.vlgmr.msra.gmra.mrb[8].mxu0 %vm1177_vm1, %v2140_v59 }
 0xced   : > { %4093 = vmatpush3.bf16.xpose.msk.msra.mxu0 %vm4477_vm2, %v4088_v6  ;;  %3937 = vmatprep.mubr.msk.f32.mxu0 %vm1177_vm1, %v2442_v7  ;;  %v4098_v7 = vpack.c.bf16 %v3649_v3, %v3648_v2  ;;  %v3677_v2 = vld [vmem:[%s4593_s23 + $0x1] ss:$0 sm:$0xff] }
 0xcf4   : > { %3938 = vmatmul.mubr.msk.f32.vlgmr.msra.gmra.mrb[10].mxu0 %vm1177_vm1, %v2444_v8 }
 0xdbf   : > { %v3918_v9 = vpop.f32.mrb[8].mxu0 }
 0xdc0   : > { %v2240_v10 = vmul.f32 0.25, %v3918_v9  ;;  %v2230_v11 = vpop.f32.mrb[9].mxu0 }
 0xdc1   : > { %v2239_v12 = vmul.f32 0.25, %v2230_v11 }
 0xdc2   : > { %v2242_v13 = vadd.f32 %v2240_v10, %v4495_v54 }
 0xdc3   : > { %v2241_v14 = vadd.f32 %v2239_v12, %v4500_v58 }
 0xdc4   : > { %v2246_v15 = vsel %vm1177_vm1, %v2242_v13, -inf }
 0xdc5   : > { %2247 = vmax.xlane.f32.xlu1 %v2246_v15  ;;  %v2243_v33 = vsel %vm1177_vm1, %v2241_v14, -inf }
 0xdc6   : > { %2244 = vmax.xlane.f32.xlu0 %v2243_v33 }
 0xdc7   : > { %v3939_v48 = vpop.f32.mrb[10].mxu0 }
 0xdc8   : > { %v2523_v35 = vpop.f32.mrb[11].mxu0  ;;  %v2533_v16 = vmul.f32 0.25, %v3939_v48 }
 0xdc9   : > { %v2532_v17 = vmul.f32 0.25, %v2523_v35 }
 0xdca   : > { %v2535_v20 = vadd.f32 %v2533_v16, %v4495_v54 }
 0xdcb   : > { %v2534_v18 = vadd.f32 %v2532_v17, %v4500_v58 }
 0xdcc   : > { %v2539_v21 = vsel %vm1177_vm1, %v2535_v20, -inf }
 0xdcd   : > { %v2536_v19 = vsel %vm1177_vm1, %v2534_v18, -inf }
 0xdce   : > { %2537 = vmax.xlane.f32.xlu1 %v2536_v19 }
 0xdd2   : > { %2540 = vmax.xlane.f32.xlu1 %v2539_v21 }
 0xe52   : > { %v2248_v22 = vpop.xlane.xlu1 %2247 }
 0xe53   : > { %v2250_v23 = vsub.f32 %v2242_v13, %v2248_v22  ;;  %v2245_v24 = vpop.xlane.xlu0 %2244  ;;  %v3659_v13 = vld [vmem:[%s4540_s2 + $0x1] ss:$0 sm:$0xff] }
 0xe54   : > { %v2249_v25 = vsub.f32 %v2241_v14, %v2245_v24 }
 0xe55   : > { %v2253_v26 = vmul.f32 1.442695, %v2250_v23 }
 0xe56   : > { %v2251_v27 = vmul.f32 1.442695, %v2249_v25 }
 0xe57   : > { %4235 = vpow2.f32 %v2253_v26 }
 0xe58   : > { %4237 = vpow2.f32 %v2251_v27  ;;  %v3672_v27 = vld [vmem:[%s4553_s5 + $0x20] sm:$0xff] }
 0xe5b   : > { %v2538_v28 = vpop.xlane.xlu1 %2537 }
 0xe5c   : > { %v2542_v29 = vsub.f32 %v2534_v18, %v2538_v28  ;;  %v3673_v28 = vld [vmem:[%s4553_s5 + $0x28] sm:$0xff] }
 0xe5e   : > { %v2544_v32 = vmul.f32 1.442695, %v2542_v29  ;;  %v4102_v29 = vpack.c.bf16 %v3673_v28, %v3672_v27 }
 0xe5f   : > { %v2541_v30 = vpop.xlane.xlu1 %2540 }
 0xe60   : > { %v2543_v58 = vsub.f32 %v2535_v20, %v2541_v30  ;;  %4103 = vmatprep.subr.bf16.mxu0 %v4102_v29  ;;  %v3674_v30 = vld [vmem:[%s4553_s5 + $0x30] sm:$0xff] }
 0xe61   : > { %v4236_v31 = vpop.eup %4235  ;;  %4105 = vmatpush3.bf16.msra.mxu0 %v4102_v29 }
 0xe62   : > { %v2546_v34 = vmul.f32 1.442695, %v2543_v58  ;;  %v2258_v54 = vsel %vm1177_vm1, %v4236_v31, 0.0  ;;  %v4238_v36 = vpop.eup %4237  ;;  %v3675_v58 = vld [vmem:[%s4553_s5 + $0x38] sm:$0xff] }
 0xe63   : > { %2259 = vadd.xlane.f32.xlu0 %v2258_v54  ;;  %v2255_v37 = vsel %vm1177_vm1, %v4238_v36, 0.0 }
 0xe64   : > { %4239 = vpow2.f32 %v2546_v34 }
 0xe65   : > { %4241 = vpow2.f32 %v2544_v32 }
 0xe67   : > { %2256 = vadd.xlane.f32.xlu0 %v2255_v37 }
 0xe6e   : > { %v4240_v38 = vpop.eup %4239 }
 0xe6f   : > { %v2551_v39 = vsel %vm1177_vm1, %v4240_v38, 0.0  ;;  %v4242_v40 = vpop.eup %4241 }
 0xe70   : > { %2552 = vadd.xlane.f32.xlu1 %v2551_v39  ;;  %v2548_v41 = vsel %vm1177_vm1, %v4242_v40, 0.0 }
 0xe74   : > { %2549 = vadd.xlane.f32.xlu1 %v2548_v41 }
 0xe7d   : > { %4194 = vrot.lane.b32.xlu0 %v4637_v62, %s4817_s27 }
 0xe85   : > { %4199 = vrot.lane.b32.xlu1 %v4637_v62, %s4818_s1  ;;  %s1010_s1 = scalar_lea.vmem %s4779_s19, %s4821_s28 }
 0xef0   : > { %v2260_v42 = vpop.xlane.xlu0 %2259 }
 0xef1   : > { %4243 = vrcp.f32 %v2260_v42  ;;  %v3671_v42 = vld [vmem:[%s4569_s30 + $0x1] ss:$0 sm:$0xff]  ;;  %s3711_s30 = sshll.u32 %s4821_s28, 5 }
 0xef2   : > { %s1001_s5 = scalar_lea.vmem %s4776_s16, %s3711_s30  ;;  %s1015_s4 = scalar_lea.vmem %s4780_s20, %s3711_s30 }
 0xef4   : > { %v2257_v43 = vpop.xlane.xlu0 %2256 }
 0xef5   : > { %4245 = vrcp.f32 %v2257_v43 }
 0xef8   : > { %v4195_v44 = vpop.permute.xlu0 %4194 }
 0xef9   : > { %v4197_v47 = vunpack.i.h.bf16 %v4195_v44  ;;  %v4196_v49 = vunpack.i.l.bf16 %v4195_v44 }
 0xefb   : > { %v4080_v50 = vpack.c.bf16 %v4197_v47, %v4196_v49  ;;  %v4244_v56 = vpop.eup %4243 }
 0xefc   : > { %v2264_v60 = vmul.f32 %v4244_v56, %v4236_v31  ;;  %v4106_v31 = vpack.c.bf16 %v3675_v58, %v3674_v30  ;;  %v3682_v56 = vld [vmem:[%s4579_s29 + $0x50] sm:$0xff] }
 0xefd   : > { %v2553_v53 = vpop.xlane.xlu1 %2552  ;;  %4081 = vmatprep.subr.bf16.mxu1 %v4080_v50 }
 0xefe   : > { %4083 = vmatpush3.bf16.msra.mxu1 %v4080_v50  ;;  %4107 = vmatprep.subr.bf16.mxu0 %v4106_v31  ;;  %v3680_v50 = vld [vmem:[%s4579_s29 + $0x40] sm:$0xff] }
 0xeff   : > { %v4246_v57 = vpop.eup %4245  ;;  %4085 = vmatprep.subr.bf16.mxu1 %v4084_v51  ;;  %4109 = vmatpush3.bf16.msra.mxu0 %v4106_v31 }
 0xf00   : > { %v2263_v59 = vmul.f32 %v4246_v57, %v4238_v36  ;;  %v3683_v57 = vld [vmem:[%s4579_s29 + $0x58] sm:$0xff] }
 0xf01   : > { %v2550_v61 = vpop.xlane.xlu1 %2549 }
 0xf02   : > { %3923 = vmatprep.mubr.msk.f32.mxu1 %vm1177_vm1, %v2263_v59  ;;  %4247 = vrcp.f32 %v2550_v61  ;;  %v4114_v59 = vpack.c.bf16 %v3683_v57, %v3682_v56  ;;  %v3685_v61 = vld [vmem:[%s4579_s29 + $0x68] sm:$0xff]  ;;  %v3694_v56 = vld [vmem:[%s4617_s7 + $0x1] ss:$0 sm:$0xff] }
 0xf03   : > { %3924 = vmatmul.mubr.msk.f32.vlgmr.msra.gmra.mrb[10].mxu1 %vm1177_vm1, %v2264_v60  ;;  %4249 = vrcp.f32 %v2553_v53  ;;  %v3684_v60 = vld [vmem:[%s4579_s29 + $0x60] sm:$0xff] }
 0xf04   : > { %4087 = vmatpush3.bf16.msra.mxu1 %v4084_v51  ;;  %v3681_v51 = vld [vmem:[%s4579_s29 + $0x48] sm:$0xff] }
 0xf05   : > { %v4200_v62 = vpop.permute.xlu1 %4199  ;;  %v4110_v53 = vpack.c.bf16 %v3681_v51, %v3680_v50 }
 0xf06   : > { %v4202_v63 = vunpack.i.h.bf16 %v4200_v62  ;;  %v4201_v0 = vunpack.i.l.bf16 %v4200_v62  ;;  %v4118_v62 = vpack.c.bf16 %v3685_v61, %v3684_v60 }
 0xf08   : > { %v4094_v1 = vpack.c.bf16 %v4202_v63, %v4201_v0  ;;  %v3686_v63 = vld [vmem:[%s4579_s29 + $0x70] sm:$0xff]  ;;  %v3687_v0 = vld [vmem:[%s4579_s29 + $0x78] sm:$0xff]  ;;  %s1004_s29 = scalar_lea.vmem %s4777_s17, %s4821_s28 }
 0xf0a   : > { %4095 = vmatprep.subr.bf16.mxu1 %v4094_v1 }
 0xf0c   : > { %v4248_v4 = vpop.eup %4247 }
 0xf0d   : > { %v4250_v8 = vpop.eup %4249  ;;  %v2556_v9 = vmul.f32 %v4248_v4, %v4242_v40  ;;  %v3670_v40 = vld [vmem:[%s4563_s26 + $0x1] ss:$0 sm:$0xff] }
 0xf0e   : > { %v2557_v10 = vmul.f32 %v4250_v8, %v4240_v38 }
 0xfd6   : > { %v3925_v5 = vpop.f32.mrb[10].mxu1 }
 0xfd7   : > { %v2343_v6 = vpop.f32.mrb[11].mxu1 }
 0xfd8   : > { %3930 = vmatprep.mubr.msk.f32.mxu1 %vm1177_vm1, %v2343_v6 }
 0xfd9   : > { %3931 = vmatmul.mubr.msk.f32.vlgmr.msra.gmra.mrb[12].mxu1 %vm1177_vm1, %v3925_v5 }
 0xfda   : > { %4097 = vmatpush3.bf16.msra.mxu1 %v4094_v1  ;;  %3944 = vmatprep.mubr.msk.f32.mxu1 %vm1177_vm1, %v2556_v9  ;;  %v4122_v1 = vpack.c.bf16 %v3687_v0, %v3686_v63 }
 0xfdb   : > { %4099 = vmatprep.subr.bf16.mxu1 %v4098_v7 }
 0xfdd   : > { %3945 = vmatmul.mubr.msk.f32.vlgmr.msra.gmra.mrb[14].mxu1 %vm1177_vm1, %v2557_v10 }
 0xfde   : > { %4101 = vmatpush3.bf16.msra.mxu1 %v4098_v7 }
 0xfdf   : > { %4111 = vmatprep.subr.bf16.mxu1 %v4110_v53 }
0x10b0   : > { %v3946_v11 = vpop.f32.mrb[14].mxu1 }
0x10b1   : > { %v2636_v12 = vpop.f32.mrb[15].mxu1 }
0x10b2   : > { %3951 = vmatprep.mubr.msk.f32.mxu1 %vm1177_vm1, %v2636_v12 }
0x10b3   : > { %3952 = vmatmul.mubr.msk.f32.vlgmr.msra.gmra.mrb[12].mxu1 %vm1177_vm1, %v3946_v11 }
0x10b4   : > { %4113 = vmatpush3.bf16.msra.mxu1 %v4110_v53 }
0x10b5   : > { %4115 = vmatprep.subr.bf16.mxu1 %v4114_v59 }
0x10b8   : > { %4117 = vmatpush3.bf16.msra.mxu1 %v4114_v59  ;;  %v3695_v59 = vld [vmem:[%s4623_s25 + $0x1] ss:$0 sm:$0xff] }
0x10b9   : > { %4119 = vmatprep.subr.bf16.mxu1 %v4118_v62 }
0x10bc   : > { %4121 = vmatpush3.bf16.msra.mxu1 %v4118_v62 }
0x10bd   : > { %4123 = vmatprep.subr.bf16.mxu1 %v4122_v1 }
0x10c0   : > { %4125 = vmatpush3.bf16.msra.mxu1 %v4122_v1 }
0x1186   : > { %v3953_v14 = vpop.f32.mrb[12].mxu1 }
0x1187   : > { %v4144_v15 = vadd.f32 %v3953_v14, %v3659_v13  ;;  %v2717_v33 = vpop.f32.mrb[13].mxu1 }
0x1188   : > { %v4145_v48 = vadd.f32 %v3659_v13, %v2717_v33 }
0x1189   : > { %v2729_v35 = vadd.f32 %v4144_v15, %v4631_v55 }
0x118a   : > { %v2728_v16 = vadd.f32 %v4145_v48, %v4627_v52 }
0x118b   : > { %v2737_v17 = vsel %vm1030_vm0, %v2729_v35, 0.0 }
0x118c   : > { %2738 = vadd.xlane.f32.xlu1 %v2737_v17  ;;  %v2734_v18 = vsel %vm1030_vm0, %v2728_v16, 0.0 }
0x118d   : > { %2735 = vadd.xlane.f32.xlu0 %v2734_v18 }
0x1219   : > { %v2739_v19 = vpop.xlane.xlu1 %2738 }
0x121a   : > { %v2741_v20 = vmul.f32 0.03125, %v2739_v19  ;;  %v2736_v21 = vpop.xlane.xlu0 %2735 }
0x121b   : > { %v2740_v22 = vmul.f32 0.03125, %v2736_v21 }
0x121c   : > { %v2743_v23 = vsub.f32 %v2729_v35, %v2741_v20 }
0x121d   : > { %v2742_v24 = vsub.f32 %v2728_v16, %v2740_v22  ;;  %v3689_v22 = vld [vmem:[%s4602_s6 + $0x1] ss:$0 sm:$0xff]  ;;  %s1018_s6 = scalar_lea.vmem %s4781_s21, %s4821_s28 }
0x121e   : > { %v2745_v52 = vmul.f32 %v2743_v23, %v2743_v23 }
0x121f   : > { %v2744_v25 = vmul.f32 %v2742_v24, %v2742_v24 }
0x1220   : > { %v2749_v26 = vsel %vm1030_vm0, %v2745_v52, 0.0 }
0x1221   : > { %v2746_v55 = vsel %vm1030_vm0, %v2744_v25, 0.0 }
0x1222   : > { %2747 = vadd.xlane.f32.xlu0 %v2746_v55 }
0x1226   : > { %2750 = vadd.xlane.f32.xlu0 %v2749_v26 }
0x12af   : > { %v2748_v32 = vpop.xlane.xlu0 %2747 }
0x12b0   : > { %v2752_v34 = vmul.f32 0.03125, %v2748_v32 }
0x12b2   : > { %v2754_v54 = vadd.f32 1e-12, %v2752_v34 }
0x12b3   : > { %v2751_v36 = vpop.xlane.xlu0 %2750 }
0x12b4   : > { %4251 = vrsqrt.f32 %v2754_v54  ;;  %v2753_v37 = vmul.f32 0.03125, %v2751_v36 }
0x12b6   : > { %v2755_v38 = vadd.f32 1e-12, %v2753_v37 }
0x12b8   : > { %4253 = vrsqrt.f32 %v2755_v38 }
0x12be   : > { %v4252_v39 = vpop.eup %4251 }
0x12bf   : > { %v2758_v41 = vmul.f32 %v4252_v39, %v2742_v24  ;;  %v3034_v39 = vld [vmem:[%s1001_s5] sm:$0xff] }
0x12c1   : > { %v2766_v43 = vmul.f32 %v3670_v40, %v2758_v41 }
0x12c2   : > { %v4254_v44 = vpop.eup %4253 }
0x12c3   : > { %v2759_v45 = vmul.f32 %v4254_v44, %v2743_v23  ;;  %v2774_v46 = vadd.f32 %v3671_v42, %v2766_v43  ;;  %v3037_v43 = vld [vmem:[%s1001_s5 + $0x18] sm:$0xff] }
0x12c5   : > { %v2767_v47 = vmul.f32 %v3670_v40, %v2759_v45  ;;  %3962 = vmatprep.mubr.msk.f32.mxu0 %vm1030_vm0, %v2774_v46  ;;  %v3035_v40 = vld [vmem:[%s1001_s5 + $0x8] sm:$0xff] }
0x12c6   : > { %v4126_v41 = vpack.c.bf16 %v3035_v40, %v3034_v39 }
0x12c7   : > { %v2775_v49 = vadd.f32 %v3671_v42, %v2767_v47  ;;  %v3036_v42 = vld [vmem:[%s1001_s5 + $0x10] sm:$0xff]  ;;  %s4819_s5 = sshll.u32 %s4821_s28, 4 }
0x12c8   : > { %4127 = vmatprep.subr.bf16.mxu0 %v4126_v41  ;;  %v4130_v44 = vpack.c.bf16 %v3037_v43, %v3036_v42 }
0x12c9   : > { %3963 = vmatmul.mubr.msk.f32.vlgmr.msra.gmra.mrb[12].mxu0 %vm1030_vm0, %v2775_v49 }
0x12ca   : > { %4129 = vmatpush3.bf16.msra.mxu0 %v4126_v41 }
0x12cb   : > { %4131 = vmatprep.subr.bf16.mxu0 %v4130_v44 }
0x12ce   : > { %4133 = vmatpush3.bf16.msra.mxu0 %v4130_v44 }
0x139c   : > { %v3964_v3 = vpop.f32.mrb[12].mxu0 }
0x139d   : > { %v2867_v4 = vadd.f32 %v3964_v3, %v3677_v2  ;;  %v2861_v5 = vpop.f32.mrb[13].mxu0 }
0x139e   : > { %v2862_v6 = vadd.f32 %v3677_v2, %v2861_v5  ;;  %v3696_v2 = vld [vmem:[%s1004_s29] ss:$0 sm:$0xff]  ;;  %s1023_s29 = scalar_lea.vmem %s4782_s22, %s4819_s5 }
0x139f   : > { %v2873_v7 = vmul.f32 0.044715, %v2867_v4  ;;  %v2871_v19 = vmul.f32 0.5, %v2867_v4 }
0x13a0   : > { %v2872_v8 = vmul.f32 0.044715, %v2862_v6  ;;  %v2870_v17 = vmul.f32 0.5, %v2862_v6 }
0x13a1   : > { %v2875_v9 = vmul.f32 %v2873_v7, %v2867_v4 }
0x13a2   : > { %v2874_v10 = vmul.f32 %v2872_v8, %v2862_v6 }
0x13a3   : > { %v2877_v11 = vmul.f32 %v2875_v9, %v2867_v4 }
0x13a4   : > { %v2876_v12 = vmul.f32 %v2874_v10, %v2862_v6 }
0x13a5   : > { %v2879_v13 = vadd.f32 %v2877_v11, %v2867_v4 }
0x13a6   : > { %v2878_v14 = vadd.f32 %v2876_v12, %v2862_v6 }
0x13a7   : > { %v2881_v15 = vmul.f32 0.7978846, %v2879_v13 }
0x13a8   : > { %v2880_v33 = vmul.f32 0.7978846, %v2878_v14 }
0x13a9   : > { %4255 = vtanh.f32 %v2881_v15 }
0x13aa   : > { %4257 = vtanh.f32 %v2880_v33 }
0x13b3   : > { %v4256_v48 = vpop.eup %4255 }
0x13b4   : > { %v4258_v35 = vpop.eup %4257  ;;  %v2885_v16 = vadd.f32 1.0, %v4256_v48 }
0x13b5   : > { %v2884_v18 = vadd.f32 1.0, %v4258_v35 }
0x13b6   : > { %v2887_v21 = vmul.f32 %v2885_v16, %v2871_v19 }
0x13b7   : > { %v2886_v20 = vmul.f32 %v2884_v18, %v2870_v17 }
0x13b9   : > { %3981 = vmatprep.mubr.msk.f32.mxu1 %vm1921_vm3, %v2886_v20 }
0x13ba   : > { %3982 = vmatmul.mubr.msk.f32.vlgmr.msra.gmra.mrb[16].mxu1 %vm1921_vm3, %v2887_v21 }
0x148d   : > { %v3983_v23 = vpop.f32.mrb[16].mxu1 }
0x148e   : > { %v2977_v24 = vpop.f32.mrb[17].mxu1  ;;  %v2983_v25 = vadd.f32 %v3983_v23, %v3689_v22 }
0x148f   : > { %v2978_v55 = vadd.f32 %v3689_v22, %v2977_v24 }
0x1490   : > { %v2987_v27 = vadd.f32 %v2983_v25, %v2775_v49 }
0x1491   : > { %v2986_v52 = vadd.f32 %v2978_v55, %v2774_v46 }
0x1492   : > { %v2995_v28 = vsel %vm1030_vm0, %v2987_v27, 0.0 }
0x1493   : > { %v2992_v26 = vsel %vm1030_vm0, %v2986_v52, 0.0 }
0x1494   : > { %2993 = vadd.xlane.f32.xlu0 %v2992_v26 }
0x1498   : > { %2996 = vadd.xlane.f32.xlu0 %v2995_v28 }
0x1521   : > { %v2994_v29 = vpop.xlane.xlu0 %2993 }
0x1522   : > { %v2998_v30 = vmul.f32 0.03125, %v2994_v29 }
0x1524   : > { %v3000_v58 = vsub.f32 %v2986_v52, %v2998_v30 }
0x1525   : > { %v2997_v31 = vpop.xlane.xlu0 %2996 }
0x1526   : > { %v2999_v32 = vmul.f32 0.03125, %v2997_v31  ;;  %v3002_v34 = vmul.f32 %v3000_v58, %v3000_v58  ;;  %v3188_v31 = vld [vmem:[%s1015_s4] sm:$0xff] }
0x1528   : > { %v3001_v54 = vsub.f32 %v2987_v27, %v2999_v32  ;;  %v3004_v36 = vsel %vm1030_vm0, %v3002_v34, 0.0  ;;  %v3189_v32 = vld [vmem:[%s1015_s4 + $0x8] sm:$0xff] }
0x1529   : > { %3005 = vadd.xlane.f32.xlu0 %v3004_v36  ;;  %v4134_v34 = vpack.c.bf16 %v3189_v32, %v3188_v31  ;;  %v3191_v36 = vld [vmem:[%s1015_s4 + $0x18] sm:$0xff] }
0x152a   : > { %v3003_v37 = vmul.f32 %v3001_v54, %v3001_v54 }
0x152b   : > { %4135 = vmatprep.subr.bf16.mxu0 %v4134_v34 }
0x152c   : > { %v3007_v38 = vsel %vm1030_vm0, %v3003_v37, 0.0 }
0x152d   : > { %3008 = vadd.xlane.f32.xlu1 %v3007_v38 }
0x15b6   : > { %v3006_v45 = vpop.xlane.xlu0 %3005 }
0x15b7   : > { %v3010_v46 = vmul.f32 0.03125, %v3006_v45  ;;  %v3699_v45 = vld [vmem:[%s1007_s9] ss:$0 sm:$0xff] }
0x15b9   : > { %v3012_v47 = vadd.f32 1e-12, %v3010_v46 }
0x15ba   : > { %v3009_v49 = vpop.xlane.xlu1 %3008 }
0x15bb   : > { %4259 = vrsqrt.f32 %v3012_v47  ;;  %v3011_v50 = vmul.f32 0.03125, %v3009_v49 }
0x15bd   : > { %v3013_v51 = vadd.f32 1e-12, %v3011_v50  ;;  %v3700_v50 = vld [vmem:[%s1010_s1] ss:$0 sm:$0xff] }
0x15bf   : > { %4261 = vrsqrt.f32 %v3013_v51 }
0x15c5   : > { %v4260_v53 = vpop.eup %4259 }
0x15c6   : > { %v3016_v57 = vmul.f32 %v4260_v53, %v3000_v58 }
0x15c8   : > { %v3024_v60 = vmul.f32 %v3694_v56, %v3016_v57 }
0x15c9   : > { %v4262_v61 = vpop.eup %4261 }
0x15ca   : > { %v3017_v62 = vmul.f32 %v4262_v61, %v3001_v54  ;;  %v3032_v63 = vadd.f32 %v3695_v59, %v3024_v60  ;;  %v3190_v54 = vld [vmem:[%s1015_s4 + $0x10] sm:$0xff] }
0x15cb   : > { %v4138_v37 = vpack.c.bf16 %v3191_v36, %v3190_v54 }
0x15cc   : > { %v3025_v0 = vmul.f32 %v3694_v56, %v3017_v62  ;;  %3992 = vmatprep.mubr.msk.f32.mxu0 %vm1030_vm0, %v3032_v63 }
0x15ce   : > { %v3033_v1 = vadd.f32 %v3695_v59, %v3025_v0  ;;  %v3701_v59 = vld [vmem:[%s1018_s6] ss:$0 sm:$0xff] }
0x15d0   : > { %3993 = vmatmul.mubr.msk.f32.vlgmr.msra.gmra.mrb[14].mxu0 %vm1030_vm0, %v3033_v1 }
0x15d1   : > { %4137 = vmatpush3.bf16.msra.mxu0 %v4134_v34 }
0x15d2   : > { %4139 = vmatprep.subr.bf16.mxu0 %v4138_v37 }
0x15d5   : > { %4141 = vmatpush3.bf16.msra.mxu0 %v4138_v37 }
0x16a3   : > { %v3994_v3 = vpop.f32.mrb[14].mxu0 }
0x16a4   : > { %v3123_v4 = vadd.f32 %v3994_v3, %v3696_v2  ;;  %v3117_v5 = vpop.f32.mrb[15].mxu0 }
0x16a5   : > { %v3118_v6 = vadd.f32 %v3696_v2, %v3117_v5 }
0x16a6   : > { %v3129_v7 = vmul.f32 0.044715, %v3123_v4  ;;  %v3127_v16 = vmul.f32 0.5, %v3123_v4 }
0x16a7   : > { %v3128_v8 = vmul.f32 0.044715, %v3118_v6  ;;  %v3126_v18 = vmul.f32 0.5, %v3118_v6 }
0x16a8   : > { %v3131_v9 = vmul.f32 %v3129_v7, %v3123_v4 }
0x16a9   : > { %v3130_v10 = vmul.f32 %v3128_v8, %v3118_v6 }
0x16aa   : > { %v3133_v11 = vmul.f32 %v3131_v9, %v3123_v4 }
0x16ab   : > { %v3132_v12 = vmul.f32 %v3130_v10, %v3118_v6 }
0x16ac   : > { %v3135_v13 = vadd.f32 %v3133_v11, %v3123_v4 }
0x16ad   : > { %v3134_v14 = vadd.f32 %v3132_v12, %v3118_v6 }
0x16ae   : > { %v3137_v15 = vmul.f32 0.7978846, %v3135_v13 }
0x16af   : > { %v3136_v33 = vmul.f32 0.7978846, %v3134_v14 }
0x16b0   : > { %4263 = vtanh.f32 %v3137_v15 }
0x16b1   : > { %4265 = vtanh.f32 %v3136_v33 }
0x16ba   : > { %v4264_v48 = vpop.eup %4263 }
0x16bb   : > { %v4266_v35 = vpop.eup %4265  ;;  %v3141_v17 = vadd.f32 1.0, %v4264_v48 }
0x16bc   : > { %v3140_v19 = vadd.f32 1.0, %v4266_v35 }
0x16bd   : > { %v3143_v20 = vmul.f32 %v3141_v17, %v3127_v16 }
0x16be   : > { %v3142_v21 = vmul.f32 %v3140_v19, %v3126_v18 }
0x16bf   : > { %v3149_v22 = vsel %vm1030_vm0, %v3143_v20, 0.0 }
0x16c0   : > { %3150 = vadd.xlane.f32.xlu1 %v3149_v22  ;;  %v3146_v23 = vsel %vm1030_vm0, %v3142_v21, 0.0 }
0x16c1   : > { %3147 = vadd.xlane.f32.xlu0 %v3146_v23 }
0x174d   : > { %v3151_v24 = vpop.xlane.xlu1 %3150 }
0x174e   : > { %v3153_v25 = vmul.f32 0.03125, %v3151_v24  ;;  %v3148_v55 = vpop.xlane.xlu0 %3147 }
0x174f   : > { %v3152_v52 = vmul.f32 0.03125, %v3148_v55 }
0x1750   : > { %v3155_v26 = vsub.f32 %v3143_v20, %v3153_v25 }
0x1751   : > { %v3154_v27 = vsub.f32 %v3142_v21, %v3152_v52 }
0x1752   : > { %v3157_v28 = vmul.f32 %v3155_v26, %v3155_v26 }
0x1753   : > { %v3156_v29 = vmul.f32 %v3154_v27, %v3154_v27 }
0x1754   : > { %v3161_v30 = vsel %vm1030_vm0, %v3157_v28, 0.0 }
0x1755   : > { %3162 = vadd.xlane.f32.xlu1 %v3161_v30  ;;  %v3158_v58 = vsel %vm1030_vm0, %v3156_v29, 0.0 }
0x1756   : > { %3159 = vadd.xlane.f32.xlu0 %v3158_v58 }
0x17e2   : > { %v3163_v38 = vpop.xlane.xlu1 %3162 }
0x17e3   : > { %v3165_v39 = vmul.f32 0.03125, %v3163_v38  ;;  %v3160_v40 = vpop.xlane.xlu0 %3159 }
0x17e4   : > { %v3164_v41 = vmul.f32 0.03125, %v3160_v40 }
0x17e5   : > { %v3167_v42 = vadd.f32 1e-12, %v3165_v39 }
0x17e6   : > { %v3166_v43 = vadd.f32 1e-12, %v3164_v41 }
0x17e7   : > { %4267 = vrsqrt.f32 %v3167_v42 }
0x17e8   : > { %4269 = vrsqrt.f32 %v3166_v43 }
0x17f1   : > { %v4268_v44 = vpop.eup %4267 }
0x17f2   : > { %v4270_v46 = vpop.eup %4269  ;;  %v3171_v47 = vmul.f32 %v4268_v44, %v3155_v26 }
0x17f3   : > { %v3170_v49 = vmul.f32 %v4270_v46, %v3154_v27 }
0x17f4   : > { %v3179_v51 = vmul.f32 %v3699_v45, %v3171_v47 }
0x17f5   : > { %v3178_v53 = vmul.f32 %v3699_v45, %v3170_v49 }
0x17f6   : > { %v3187_v57 = vadd.f32 %v3700_v50, %v3179_v51 }
0x17f7   : > { %v3186_v56 = vadd.f32 %v3700_v50, %v3178_v53 }
0x17f9   : > { %4003 = vmatprep.mubr.msk.f32.mxu0 %vm1030_vm0, %v3186_v56 }
0x17fa   : > { %4004 = vmatmul.mubr.msk.f32.vlgmr.msra.gmra.mrb[16].mxu0 %vm1030_vm0, %v3187_v57 }
0x18cd   : > { %v4005_v60 = vpop.f32.mrb[16].mxu0 }
0x18ce   : > { %v3277_v61 = vadd.f32 %v4005_v60, %v3701_v59  ;;  %v3271_v62 = vpop.f32.mrb[17].mxu0 }
0x18cf   : > { %v3272_v63 = vadd.f32 %v3701_v59, %v3271_v62 }
0x18d0   : > { %3282 = vmax.xlane.f32.xlu1 %v3277_v61 }
0x18d1   : > { %3280 = vmax.xlane.f32.xlu0 %v3272_v63 }
0x195d   : > { %v3283_v0 = vpop.xlane.xlu1 %3282 }
0x195e   : > { %v3285_v1 = vsub.f32 %v3277_v61, %v3283_v0  ;;  %v3281_v2 = vpop.xlane.xlu0 %3280 }
0x195f   : > { %v3284_v3 = vsub.f32 %v3272_v63, %v3281_v2 }
0x1960   : > { %v3288_v4 = vmul.f32 1.442695, %v3285_v1 }
0x1961   : > { %v3286_v5 = vmul.f32 1.442695, %v3284_v3 }
0x1962   : > { %4271 = vpow2.f32 %v3288_v4 }
0x1963   : > { %4273 = vpow2.f32 %v3286_v5 }
0x196c   : > { %v4272_v6 = vpop.eup %4271 }
0x196d   : > { %v4274_v7 = vpop.eup %4273  ;;  %3292 = vadd.xlane.f32.xlu1 %v4272_v6 }
0x196e   : > { %3290 = vadd.xlane.f32.xlu0 %v4274_v7 }
0x19fa   : > { %v3293_v8 = vpop.xlane.xlu1 %3292 }
0x19fb   : > { %4275 = vrcp.f32 %v3293_v8  ;;  %v3291_v9 = vpop.xlane.xlu0 %3290 }
0x19fc   : > { %4277 = vrcp.f32 %v3291_v9 }
0x1a05   : > { %v4276_v10 = vpop.eup %4275 }
0x1a06   : > { %v4278_v11 = vpop.eup %4277  ;;  %v3297_v12 = vmul.f32 %v4276_v10, %v4272_v6 }
0x1a07   : > { %v3295_v13 = vmul.f32 %v4278_v11, %v4274_v7 }
0x1a08   : > { %3299 = vst [vmem:[%s1023_s29 + $0x8] sm:$0xff] %v3297_v12 }
0x1a09   : > { %3298 = vst [vmem:[%s1023_s29] sm:$0xff] %v3295_v13 }
0x1a0a PF: > { %s32_s3 = sadd.s32 1, %s4285_s3  }
0x1a0b   : > { %p29_p4 = scmp.ge.s32.totalorder %s32_s3, 4  }
0x1a0d   :  { %31 = sbr.rel (!%p29_p4) target bundleno = 11 (0xb), region = 210 }

</bundles_post_ra>
